<compile_context>
chip_gen: v6e
topology: v6e:2x2x1
jax: 0.10.0
libtpu: 0.0.40
codegen_flags: <defaults>
</compile_context>

<pallas_src>
import jax
import jax.numpy as jnp
from jax import lax
from jax.experimental import pallas as pl
from jax.experimental.pallas import tpu as pltpu


def _round_up(x, m):
    return (x + m - 1) // m * m


def _make_kernel(H, W, KH, Cin, Cout):
    HW = H * W
    pad = (KH - 1) // 2
    halo = pad * W                          # rows of zeros needed above/below (36)
    halo_top = _round_up(halo, 8)           # 40: keeps all scratch stores sublane-aligned
    rows = halo_top + HW + _round_up(halo, 8)   # 224 (multiple of 8)

    def kernel(x_ref, w_ref, scale_ref, bias_ref, o_ref, xp_ref, im_ref):
        # x_ref     : [HW, Cin]      f32 channels-last, pre-ReLU, unpadded
        # w_ref     : [Cout, KH*Cin] bf16, w_t[co, kh*Cin+ci] = weight[co, ci, kh, 0]
        # scale_ref : [Cout, 1]      f32 folded BN scale
        # bias_ref  : [Cout, 1]      f32 folded BN bias
        # o_ref     : [Cout, HW]     channels-first output block
        # xp_ref    : [rows, Cin]    f32 scratch, H-padded channels-last activations
        # im_ref    : [HW, KH*Cin]   bf16 scratch, im2col matrix

        # Zero only the halo bands the tap windows can read, then ReLU once on the
        # un-expanded input (all stores at sublane-aligned offsets).
        xp_ref[0:halo_top, :] = jnp.zeros((halo_top, Cin), xp_ref.dtype)
        xp_ref[halo_top + HW:rows, :] = jnp.zeros((rows - halo_top - HW, Cin),
                                                  xp_ref.dtype)
        xp_ref[halo_top:halo_top + HW, :] = jnp.maximum(x_ref[...], 0.0)

        # In-kernel im2col: 7 statically shifted [HW, Cin] windows -> [HW, KH*Cin].
        for kh in range(KH):
            src = halo_top - halo + kh * W          # 4 + 12*kh
            im_ref[:, kh * Cin:(kh + 1) * Cin] = (
                xp_ref[src:src + HW, :].astype(im_ref.dtype))

        # One fused NT matmul: out[co, hw] = sum_r w_t[co, r] * im[hw, r]
        acc = lax.dot_general(
            w_ref[...], im_ref[...],
            dimension_numbers=(((1,), (1,)), ((), ())),
            preferred_element_type=jnp.float32)     # [Cout, HW] f32

        y = acc * scale_ref[...] + bias_ref[...]    # folded BatchNorm (per output row)
        o_ref[...] = jnp.maximum(y, 0.0).astype(o_ref.dtype)

    return kernel, rows


def prepare_params(weight, gamma, beta, running_mean, running_var, eps=1e-3):
    """Hoisted prep — call once; the results are constants across forward calls."""
    Cout, Cin, KH, KW = weight.shape
    assert KW == 1 and KH % 2 == 1
    # w_t[co, kh*Cin + ci] = weight[co, ci, kh, 0]
    w_t = jnp.transpose(weight[:, :, :, 0], (0, 2, 1)).reshape(Cout, KH * Cin)
    w_t = w_t.astype(jnp.bfloat16)
    scale = (gamma / jnp.sqrt(running_var + eps)).astype(jnp.float32)
    bias = (beta - running_mean * scale).astype(jnp.float32)
    return w_t, scale.reshape(Cout, 1), bias.reshape(Cout, 1)


@jax.jit
def relu_conv_bn_relu(x_nchw, w_t, scale, bias):
    N, Cin, H, W = x_nchw.shape
    Cout, KHC = w_t.shape
    KH = KHC // Cin
    HW = H * W
    kernel, rows = _make_kernel(H, W, KH, Cin, Cout)

    # NCHW -> [N, HW, Cin] (single remaining wrapper layout op; see TODO above).
    x = jnp.transpose(x_nchw, (0, 2, 3, 1)).reshape(N, HW, Cin)

    out = pl.pallas_call(
        kernel,
        out_shape=jax.ShapeDtypeStruct((N, Cout, HW), x_nchw.dtype),
        grid=(N,),
        in_specs=[
            pl.BlockSpec((None, HW, Cin), lambda n: (n, 0, 0)),   # activations
            pl.BlockSpec((Cout, KHC), lambda n: (0, 0)),          # constant weight
            pl.BlockSpec((Cout, 1), lambda n: (0, 0)),            # constant BN scale
            pl.BlockSpec((Cout, 1), lambda n: (0, 0)),            # constant BN bias
        ],
        out_specs=pl.BlockSpec((None, Cout, HW), lambda n: (n, 0, 0)),
        scratch_shapes=[
            pltpu.VMEM((rows, Cin), jnp.float32),       # padded activations
            pltpu.VMEM((HW, KHC), jnp.bfloat16),        # im2col matrix
        ],
        compiler_params=pltpu.CompilerParams(
            dimension_semantics=("parallel",)),
    )(x, w_t, scale, bias)

    # [N, Cout, HW] is already channels-first: free reshape, no transpose, no slice.
    return out.reshape(N, Cout, H, W)


def _reference(x, weight, gamma, beta, rm, rv, eps=1e-3):
    x = jnp.maximum(x, 0.0)
    y = lax.conv_general_dilated(
        x, weight, window_strides=(1, 1), padding=((3, 3), (0, 0)),
        dimension_numbers=("NCHW", "OIHW", "NCHW"))
    scale = gamma / jnp.sqrt(rv + eps)
    bias = beta - rm * scale
    y = y * scale[None, :, None, None] + bias[None, :, None, None]
    return jnp.maximum(y, 0.0)


if __name__ == "__main__":
    key = jax.random.PRNGKey(0)
    k_x, k_w, k_g, k_b, k_m, k_v = jax.random.split(key, 6)

    N, Cin, H, W = 1, 128, 12, 12
    Cout, KH = 192, 7

    x = jax.random.normal(k_x, (N, Cin, H, W), dtype=jnp.float32)
    weight = jax.random.normal(k_w, (Cout, Cin, KH, 1), dtype=jnp.float32) * 0.05
    gamma = 1.0 + 0.1 * jax.random.normal(k_g, (Cout,), dtype=jnp.float32)
    beta = 0.1 * jax.random.normal(k_b, (Cout,), dtype=jnp.float32)
    running_mean = 0.1 * jax.random.normal(k_m, (Cout,), dtype=jnp.float32)
    running_var = jnp.abs(jax.random.normal(k_v, (Cout,), dtype=jnp.float32)) + 0.5

    w_t, scale, bias = prepare_params(weight, gamma, beta, running_mean, running_var)

    out = relu_conv_bn_relu(x, w_t, scale, bias)
    out = jax.block_until_ready(out)

    ref = _reference(x, weight, gamma, beta, running_mean, running_var)
    assert out.shape == (N, Cout, H, W), out.shape
    # bf16 MXU operands (f32 accumulation) -> relaxed tolerance vs. the f32 reference.
    err = float(jnp.max(jnp.abs(out - ref)))
    assert jnp.allclose(out, ref, atol=6e-2, rtol=6e-2), err

    print("KERNEL_OK")
</pallas_src>

<mosaic_0001>
module attributes {stable_mosaic.version = 11 : i64} {
  func.func @kernel(%arg0: i32, %arg1: memref<1x144x128xf32, #tpu.memory_space<vmem>>, %arg2: memref<192x896xbf16, #tpu.memory_space<vmem>>, %arg3: memref<192x1xf32, #tpu.memory_space<vmem>>, %arg4: memref<192x1xf32, #tpu.memory_space<vmem>>, %arg5: memref<1x192x144xf32, #tpu.memory_space<vmem>>, %arg6: memref<224x128xf32, #tpu.memory_space<vmem>>, %arg7: memref<144x896xbf16, #tpu.memory_space<vmem>>) attributes {dimension_semantics = [#tpu.dimension_semantics<parallel>], iteration_bounds = array<i64: 1>, scalar_prefetch = 0 : i64, scratch_operands = 2 : i64, tpu.core_type = #tpu.core_type<tc>, window_params = [{transform_indices = @transform_0, window_bounds = array<i64: 1, 144, 128>}, {pipeline_mode = #tpu.pipeline_mode<synchronous>, transform_indices = @transform_1, window_bounds = array<i64: 192, 896>}, {pipeline_mode = #tpu.pipeline_mode<synchronous>, transform_indices = @transform_2, window_bounds = array<i64: 192, 1>}, {pipeline_mode = #tpu.pipeline_mode<synchronous>, transform_indices = @transform_3, window_bounds = array<i64: 192, 1>}, {transform_indices = @transform_4, window_bounds = array<i64: 1, 192, 144>}]} {
    %cst = arith.constant 0.000000e+00 : f32
    %0 = vector.broadcast %cst : f32 to vector<40x128xf32>
    %c0 = arith.constant 0 : index
    %c0_0 = arith.constant 0 : index
    %1 = vector.load %arg6[%c0, %c0_0] : memref<224x128xf32, #tpu.memory_space<vmem>>, vector<40x128xf32>
    tpu.vector_store %arg6[%c0, %c0_0], %0 {strides = array<i32>} : memref<224x128xf32, #tpu.memory_space<vmem>>, vector<40x128xf32>,
    %cst_1 = arith.constant 0.000000e+00 : f32
    %2 = vector.broadcast %cst_1 : f32 to vector<40x128xf32>
    %c184 = arith.constant 184 : index
    %c0_2 = arith.constant 0 : index
    %3 = vector.load %arg6[%c184, %c0_2] : memref<224x128xf32, #tpu.memory_space<vmem>>, vector<40x128xf32>
    tpu.vector_store %arg6[%c184, %c0_2], %2 {strides = array<i32>} : memref<224x128xf32, #tpu.memory_space<vmem>>, vector<40x128xf32>,
    %c0_3 = arith.constant 0 : index
    %c0_4 = arith.constant 0 : index
    %c0_5 = arith.constant 0 : index
    %4 = vector.load %arg1[%c0_3, %c0_4, %c0_5] : memref<1x144x128xf32, #tpu.memory_space<vmem>>, vector<1x144x128xf32>
    %5 = vector.shape_cast %4 : vector<1x144x128xf32> to vector<144x128xf32>
    %cst_6 = arith.constant 0.000000e+00 : f32
    %6 = vector.broadcast %cst_6 : f32 to vector<144x128xf32>
    %7 = arith.maximumf %5, %6 : vector<144x128xf32>
    %c40 = arith.constant 40 : index
    %c0_7 = arith.constant 0 : index
    %8 = vector.load %arg6[%c40, %c0_7] : memref<224x128xf32, #tpu.memory_space<vmem>>, vector<144x128xf32>
    tpu.vector_store %arg6[%c40, %c0_7], %7 {strides = array<i32>} : memref<224x128xf32, #tpu.memory_space<vmem>>, vector<144x128xf32>,
    %c4 = arith.constant 4 : index
    %c0_8 = arith.constant 0 : index
    %9 = vector.load %arg6[%c4, %c0_8] : memref<224x128xf32, #tpu.memory_space<vmem>>, vector<144x128xf32>
    %10 = arith.truncf %9 : vector<144x128xf32> to vector<144x128xbf16>
    %c0_9 = arith.constant 0 : index
    %c0_10 = arith.constant 0 : index
    %11 = vector.load %arg7[%c0_9, %c0_10] : memref<144x896xbf16, #tpu.memory_space<vmem>>, vector<144x128xbf16>
    tpu.vector_store %arg7[%c0_9, %c0_10], %10 {strides = array<i32>} : memref<144x896xbf16, #tpu.memory_space<vmem>>, vector<144x128xbf16>,
    %c16 = arith.constant 16 : index
    %c0_11 = arith.constant 0 : index
    %12 = vector.load %arg6[%c16, %c0_11] : memref<224x128xf32, #tpu.memory_space<vmem>>, vector<144x128xf32>
    %13 = arith.truncf %12 : vector<144x128xf32> to vector<144x128xbf16>
    %c0_12 = arith.constant 0 : index
    %c128 = arith.constant 128 : index
    %14 = vector.load %arg7[%c0_12, %c128] : memref<144x896xbf16, #tpu.memory_space<vmem>>, vector<144x128xbf16>
    tpu.vector_store %arg7[%c0_12, %c128], %13 {strides = array<i32>} : memref<144x896xbf16, #tpu.memory_space<vmem>>, vector<144x128xbf16>,
    %c28 = arith.constant 28 : index
    %c0_13 = arith.constant 0 : index
    %15 = vector.load %arg6[%c28, %c0_13] : memref<224x128xf32, #tpu.memory_space<vmem>>, vector<144x128xf32>
    %16 = arith.truncf %15 : vector<144x128xf32> to vector<144x128xbf16>
    %c0_14 = arith.constant 0 : index
    %c256 = arith.constant 256 : index
    %17 = vector.load %arg7[%c0_14, %c256] : memref<144x896xbf16, #tpu.memory_space<vmem>>, vector<144x128xbf16>
    tpu.vector_store %arg7[%c0_14, %c256], %16 {strides = array<i32>} : memref<144x896xbf16, #tpu.memory_space<vmem>>, vector<144x128xbf16>,
    %c40_15 = arith.constant 40 : index
    %c0_16 = arith.constant 0 : index
    %18 = vector.load %arg6[%c40_15, %c0_16] : memref<224x128xf32, #tpu.memory_space<vmem>>, vector<144x128xf32>
    %19 = arith.truncf %18 : vector<144x128xf32> to vector<144x128xbf16>
    %c0_17 = arith.constant 0 : index
    %c384 = arith.constant 384 : index
    %20 = vector.load %arg7[%c0_17, %c384] : memref<144x896xbf16, #tpu.memory_space<vmem>>, vector<144x128xbf16>
    tpu.vector_store %arg7[%c0_17, %c384], %19 {strides = array<i32>} : memref<144x896xbf16, #tpu.memory_space<vmem>>, vector<144x128xbf16>,
    %c52 = arith.constant 52 : index
    %c0_18 = arith.constant 0 : index
    %21 = vector.load %arg6[%c52, %c0_18] : memref<224x128xf32, #tpu.memory_space<vmem>>, vector<144x128xf32>
    %22 = arith.truncf %21 : vector<144x128xf32> to vector<144x128xbf16>
    %c0_19 = arith.constant 0 : index
    %c512 = arith.constant 512 : index
    %23 = vector.load %arg7[%c0_19, %c512] : memref<144x896xbf16, #tpu.memory_space<vmem>>, vector<144x128xbf16>
    tpu.vector_store %arg7[%c0_19, %c512], %22 {strides = array<i32>} : memref<144x896xbf16, #tpu.memory_space<vmem>>, vector<144x128xbf16>,
    %c64 = arith.constant 64 : index
    %c0_20 = arith.constant 0 : index
    %24 = vector.load %arg6[%c64, %c0_20] : memref<224x128xf32, #tpu.memory_space<vmem>>, vector<144x128xf32>
    %25 = arith.truncf %24 : vector<144x128xf32> to vector<144x128xbf16>
    %c0_21 = arith.constant 0 : index
    %c640 = arith.constant 640 : index
    %26 = vector.load %arg7[%c0_21, %c640] : memref<144x896xbf16, #tpu.memory_space<vmem>>, vector<144x128xbf16>
    tpu.vector_store %arg7[%c0_21, %c640], %25 {strides = array<i32>} : memref<144x896xbf16, #tpu.memory_space<vmem>>, vector<144x128xbf16>,
    %c76 = arith.constant 76 : index
    %c0_22 = arith.constant 0 : index
    %27 = vector.load %arg6[%c76, %c0_22] : memref<224x128xf32, #tpu.memory_space<vmem>>, vector<144x128xf32>
    %28 = arith.truncf %27 : vector<144x128xf32> to vector<144x128xbf16>
    %c0_23 = arith.constant 0 : index
    %c768 = arith.constant 768 : index
    %29 = vector.load %arg7[%c0_23, %c768] : memref<144x896xbf16, #tpu.memory_space<vmem>>, vector<144x128xbf16>
    tpu.vector_store %arg7[%c0_23, %c768], %28 {strides = array<i32>} : memref<144x896xbf16, #tpu.memory_space<vmem>>, vector<144x128xbf16>,
    %c0_24 = arith.constant 0 : index
    %c0_25 = arith.constant 0 : index
    %30 = vector.load %arg2[%c0_24, %c0_25] : memref<192x896xbf16, #tpu.memory_space<vmem>>, vector<192x896xbf16>
    %c0_26 = arith.constant 0 : index
    %c0_27 = arith.constant 0 : index
    %31 = vector.load %arg7[%c0_26, %c0_27] : memref<144x896xbf16, #tpu.memory_space<vmem>>, vector<144x896xbf16>
    %cst_28 = arith.constant dense<0.000000e+00> : vector<192x144xf32>
    %32 = tpu.matmul %30, %31, %cst_28 {dimension_numbers = #tpu.dot_dimension_numbers<[1], [1], [0], [0], [0, 0, 1, 0], [], []>} : vector<192x896xbf16>, vector<144x896xbf16>, vector<192x144xf32> -> vector<192x144xf32>
    %c0_29 = arith.constant 0 : index
    %c0_30 = arith.constant 0 : index
    %33 = vector.load %arg3[%c0_29, %c0_30] : memref<192x1xf32, #tpu.memory_space<vmem>>, vector<192x1xf32>
    %34 = vector.broadcast %33 : vector<192x1xf32> to vector<192x144xf32>
    %35 = arith.mulf %32, %34 : vector<192x144xf32>
    %c0_31 = arith.constant 0 : index
    %c0_32 = arith.constant 0 : index
    %36 = vector.load %arg4[%c0_31, %c0_32] : memref<192x1xf32, #tpu.memory_space<vmem>>, vector<192x1xf32>
    %37 = vector.broadcast %36 : vector<192x1xf32> to vector<192x144xf32>
    %38 = arith.addf %35, %37 : vector<192x144xf32>
    %cst_33 = arith.constant 0.000000e+00 : f32
    %39 = vector.broadcast %cst_33 : f32 to vector<192x144xf32>
    %40 = arith.maximumf %38, %39 : vector<192x144xf32>
    %c0_34 = arith.constant 0 : index
    %c0_35 = arith.constant 0 : index
    %c0_36 = arith.constant 0 : index
    %41 = vector.load %arg5[%c0_34, %c0_35, %c0_36] : memref<1x192x144xf32, #tpu.memory_space<vmem>>, vector<1x192x144xf32>
    %42 = vector.shape_cast %41 : vector<1x192x144xf32> to vector<192x144xf32>
    %43 = vector.shape_cast %40 : vector<192x144xf32> to vector<1x192x144xf32>
    tpu.vector_store %arg5[%c0_34, %c0_35, %c0_36], %43 {strides = array<i32>} : memref<1x192x144xf32, #tpu.memory_space<vmem>>, vector<1x192x144xf32>,
    return
  }
  func.func @transform_0(%arg0: i32) -> (i32, i32, i32) {
    %c0_i32 = arith.constant 0 : i32
    %c0_i32_0 = arith.constant 0 : i32
    %c0_i32_1 = arith.constant 0 : i32
    return %arg0, %c0_i32, %c0_i32_0 : i32, i32, i32
  }
  func.func @transform_1(%arg0: i32) -> (i32, i32) {
    %c0_i32 = arith.constant 0 : i32
    %c0_i32_0 = arith.constant 0 : i32
    %c0_i32_1 = arith.constant 0 : i32
    return %c0_i32, %c0_i32_0 : i32, i32
  }
  func.func @transform_2(%arg0: i32) -> (i32, i32) {
    %c0_i32 = arith.constant 0 : i32
    %c0_i32_0 = arith.constant 0 : i32
    %c0_i32_1 = arith.constant 0 : i32
    return %c0_i32, %c0_i32_0 : i32, i32
  }
  func.func @transform_3(%arg0: i32) -> (i32, i32) {
    %c0_i32 = arith.constant 0 : i32
    %c0_i32_0 = arith.constant 0 : i32
    %c0_i32_1 = arith.constant 0 : i32
    return %c0_i32, %c0_i32_0 : i32, i32
  }
  func.func @transform_4(%arg0: i32) -> (i32, i32, i32) {
    %c0_i32 = arith.constant 0 : i32
    %c0_i32_0 = arith.constant 0 : i32
    %c0_i32_1 = arith.constant 0 : i32
    return %arg0, %c0_i32, %c0_i32_0 : i32, i32, i32
  }
}

</mosaic_0001>

<bundles_post_ra>
// kernel: relu_conv_bn_relu.1
= control target key start
LH: loop header
LB: loop body
LE: loop exit
PB: predicated region body
PF: predicated region fallthrough
CT: control target
= control target key end

     0   :  { %9 = vsyncpa [#allocation5], 0  ;;  %s3503_s15 = smov [#allocation4]   ;;  %s4170_s0 = inlined_call_operand.vmem [shape: f32[1,144,128], index: 0, kind: input, shape index: {}]   ;;  %s4171_s1 = inlined_call_operand.hbm [shape: bf16[192,896], index: 1, kind: input, shape index: {}]   ;;  %s4172_s2 = inlined_call_operand.vmem [shape: f32[192,1], index: 2, kind: input, shape index: {}]   ;;  %s4173_s3 = inlined_call_operand.vmem [shape: f32[192,1], index: 3, kind: input, shape index: {}]   ;;  %s4174_s4 = inlined_call_operand.vmem [shape: f32[1,192,144], index: 4, kind: output, shape index: {}]  }
   0x1   :  { %s17_s16 = sshll.u32 %s3503_s15, 4  ;;  %s18_s16 = int_to_ptr.vmem [resolvable:$true] %s17_s16 }
   0x2   :  { %s3489_s17 = scalar_lea.vmem %s18_s16, 10752  ;;  %p3494_p1 = scmp.lt.s32.totalorder %s18_s16, %s18_s16 }
   0x3   :  { %p3490_p0 = scmp.ne.s32.totalorder %s18_s16, %s3489_s17  ;;  %p3495_p2 = scmp.lt.s32.totalorder %s3489_s17, %s3489_s17 }
   0x5   :  { %p3496_p3 = por %p3495_p2, %p3494_p1 }
   0x7   :  { %p3497_p4 = pnand %p3496_p3, %p3490_p0 }
   0x9   :  { %3500 = shalt.err (!%p3497_p4)
}
   0xa   :  { %s3504_s18 = smov 448   ;;  %s3505_s19 = smov 28  }
   0xb   :  { %23 = dma.hbm_to_vmem [thread:$0]  %s4171_s1, 10752, %s18_s16, [#allocation5], %s3504_s18, %s3504_s18, %s3505_s19  }
   0xc   :  { %3501 = dma.done.wait [#allocation5], 10752  }
   0xd   :  { %3502 = vsyncadd [#allocation5], 4294956544  ;;  %v3506_v0 = vmov 0.0   ;;  %v3507_v1 = vmov 0   ;;  %v3508_v2 = vmov 0.0|0.0   ;;  %v51_v3 = vld [vmem:[%s4170_s0 + $0x48] sm:$0xff] }
   0xe   :  { %36 = vst [vmem:[#allocation2 + $0x20] sm:$0xff] %v3506_v0  ;;  %32 = vst [vmem:[#allocation2] sm:$0xff] %v3506_v0  ;;  %3279 = vset.pattern.permute.xlu1 %v3507_v1  ;;  %3278 = vset.pattern.permute.xlu0 %v3507_v1  ;;  %v52_v4 = vld [vmem:[%s4170_s0 + $0x50] sm:$0xff]  ;;  %v53_v5 = vld [vmem:[%s4170_s0 + $0x58] sm:$0xff]  ;;  %v69_v7 = vmax.f32 %v51_v3, 0.0  ;;  %vm2821_vm0 = vcmask 130048  }
   0xf   :  { %33 = vst [vmem:[#allocation2 + $0x8] sm:$0xff] %v3506_v0  ;;  %34 = vst [vmem:[#allocation2 + $0x10] sm:$0xff] %v3506_v0  ;;  %v54_v6 = vld [vmem:[%s4170_s0 + $0x60] sm:$0xff]  ;;  %v70_v8 = vmax.f32 %v52_v4, 0.0  ;;  %v71_v9 = vmax.f32 %v53_v5, 0.0  ;;  %v55_v10 = vld [vmem:[%s4170_s0 + $0x68] sm:$0xff] }
  0x10   :  { %35 = vst [vmem:[#allocation2 + $0x18] sm:$0xff] %v3506_v0  ;;  %37 = vst [vmem:[#allocation2 + $0xb8] sm:$0xff] %v3506_v0  ;;  %v56_v11 = vld [vmem:[%s4170_s0 + $0x70] sm:$0xff]  ;;  %v72_v12 = vmax.f32 %v54_v6, 0.0  ;;  %v57_v13 = vld [vmem:[%s4170_s0 + $0x78] sm:$0xff]  ;;  %v73_v14 = vmax.f32 %v55_v10, 0.0  ;;  %v3177_v27 = vpack.c.bf16 %v69_v7, %v69_v7 }
  0x11   :  { %38 = vst [vmem:[#allocation2 + $0xc0] sm:$0xff] %v3506_v0  ;;  %39 = vst [vmem:[#allocation2 + $0xc8] sm:$0xff] %v3506_v0  ;;  %v74_v15 = vmax.f32 %v56_v11, 0.0  ;;  %v49_v16 = vld [vmem:[%s4170_s0 + $0x38] sm:$0xff]  ;;  %v50_v17 = vld [vmem:[%s4170_s0 + $0x40] sm:$0xff]  ;;  %v3179_v18 = vpack.c.bf16 %v71_v9, %v71_v9  ;;  %v75_v19 = vmax.f32 %v57_v13, 0.0  ;;  %v3178_v28 = vpack.c.bf16 %v70_v8, %v70_v8 }
  0x12   :  { %40 = vst [vmem:[#allocation2 + $0xd0] sm:$0xff] %v3506_v0  ;;  %41 = vst [vmem:[#allocation2 + $0xd8] sm:$0xff] %v3506_v0  ;;  %v67_v20 = vmax.f32 %v49_v16, 0.0  ;;  %v68_v21 = vmax.f32 %v50_v17, 0.0  ;;  %v47_v22 = vld [vmem:[%s4170_s0 + $0x28] sm:$0xff]  ;;  %v48_v23 = vld [vmem:[%s4170_s0 + $0x30] sm:$0xff]  ;;  %v3180_v25 = vpack.c.bf16 %v72_v12, %v72_v12  ;;  %v3214_v33 = vpack.c.bf16 %v73_v14, %v73_v14 }
  0x13   :  { %296 = vst [vmem:[#allocation3 + $0x3c] sm:$0xf] %v3508_v2  ;;  %294 = vst [vmem:[#allocation3 + $0x4] sm:$0xf] %v3508_v2  ;;  %v45_v24 = vld [vmem:[%s4170_s0 + $0x18] sm:$0xff]  ;;  %v3215_v26 = vpack.c.bf16 %v74_v15, %v74_v15  ;;  %v46_v29 = vld [vmem:[%s4170_s0 + $0x20] sm:$0xff]  ;;  %v3216_v32 = vpack.c.bf16 %v75_v19, %v75_v19 }
  0x14   :  { %295 = vst [vmem:[#allocation3 + $0x20] sm:$0xf] %v3508_v2  ;;  %741 = vst [vmem:[#allocation3 + $0x1b8] sm:$0xf] %v3508_v2  ;;  %v43_v30 = vld [vmem:[%s4170_s0 + $0x8] sm:$0xff]  ;;  %v44_v31 = vld [vmem:[%s4170_s0 + $0x10] sm:$0xff]  ;;  %v3175_v39 = vpack.c.bf16 %v67_v20, %v67_v20  ;;  %v3176_v40 = vpack.c.bf16 %v68_v21, %v68_v21 }
  0x15   :  { %742 = vst [vmem:[#allocation3 + $0x1d4] sm:$0xf] %v3508_v2  ;;  %743 = vst [vmem:[#allocation3 + $0x1f0] sm:$0xf] %v3508_v2  ;;  %v65_v34 = vmax.f32 %v47_v22, 0.0  ;;  %v66_v35 = vmax.f32 %v48_v23, 0.0 }
  0x16   :  { %87 = vst [vmem:[#allocation2 + $0x70] sm:$0xff] %v69_v7  ;;  %88 = vst [vmem:[#allocation2 + $0x78] sm:$0xff] %v70_v8  ;;  %v42_v36 = vld [vmem:[%s4170_s0] sm:$0xff]  ;;  %v63_v41 = vmax.f32 %v45_v24, 0.0  ;;  %v64_v42 = vmax.f32 %v46_v29, 0.0  ;;  %v3587_v44 = vld [vmem:[#allocation2 + $0xc] sm:$0xff] }
  0x17   :  { %89 = vst [vmem:[#allocation2 + $0x80] sm:$0xff] %v71_v9  ;;  %90 = vst [vmem:[#allocation2 + $0x88] sm:$0xff] %v72_v12  ;;  %v98_v37 = vld [vmem:[#allocation2 + $0x14] sm:$0xff]  ;;  %v99_v38 = vld [vmem:[#allocation2 + $0x1c] sm:$0xff]  ;;  %v3173_v46 = vpack.c.bf16 %v65_v34, %v65_v34  ;;  %v3174_v47 = vpack.c.bf16 %v66_v35, %v66_v35  ;;  %v61_v48 = vmax.f32 %v43_v30, 0.0  ;;  %v62_v49 = vmax.f32 %v44_v31, 0.0 }
  0x18   :  { %91 = vst [vmem:[#allocation2 + $0x90] sm:$0xff] %v73_v14  ;;  %92 = vst [vmem:[#allocation2 + $0x98] sm:$0xff] %v74_v15  ;;  %v96_v43 = vld [vmem:[#allocation2 + $0x4] sm:$0xff]  ;;  %v3171_v51 = vpack.c.bf16 %v63_v41, %v63_v41  ;;  %v3172_v52 = vpack.c.bf16 %v64_v42, %v64_v42  ;;  %v60_v53 = vmax.f32 %v42_v36, 0.0  ;;  %v3149_v54 = vpack.c.bf16 %v98_v37, %v98_v37  ;;  %v3327_v55 = vld [vmem:[#allocation4 + $0x4] ss:$28 sps:$4 sm:$0xff]  }
  0x19   :  { %308 = vst [vmem:[#allocation3 + $0x18c] sm:$0xf] %v3179_v18  ;;  %93 = vst [vmem:[#allocation2 + $0xa0] sm:$0xff] %v75_v19  ;;  %v58_v45 = vld [vmem:[%s4170_s0 + $0x80] sm:$0xff]  ;;  %v59_v50 = vld [vmem:[%s4170_s0 + $0x88] sm:$0xff]  ;;  %v3169_v56 = vpack.c.bf16 %v61_v48, %v61_v48  ;;  %v3170_v57 = vpack.c.bf16 %v62_v49, %v62_v49  ;;  %v3150_v58 = vpack.c.bf16 %v99_v38, %v99_v38  ;;  %1808 = vmatprep.mubr.bf16.mxu0 %v3327_v55 }
  0x1a   :  { %85 = vst [vmem:[#allocation2 + $0x60] sm:$0xff] %v67_v20  ;;  %86 = vst [vmem:[#allocation2 + $0x68] sm:$0xff] %v68_v21  ;;  %v3147_v59 = vpack.c.bf16 %v96_v43, %v96_v43  ;;  %v3330_v60 = vld [vmem:[#allocation4 + $0xc] ss:$28 sps:$4 sm:$0xff]   ;;  %v3168_v63 = vpack.c.bf16 %v60_v53, %v60_v53  ;;  %v3148_v0 = vpack.c.bf16 %v3587_v44, %v3587_v44  ;;  %v76_v2 = vmax.f32 %v58_v45, 0.0 }
  0x1b   :  { %521 = vst [vmem:[#allocation3 + $0x140] sm:$0xf] %v3179_v18  ;;  %309 = vst [vmem:[#allocation3 + $0x1a8] sm:$0xf] %v3180_v25  ;;  %v77_v3 = vmax.f32 %v59_v50, 0.0  ;;  %v758_v4 = vld [vmem:[#allocation2 + $0xbc] sm:$0xff]  ;;  %1961 = vmatprep.mubr.bf16.mxu1 %v3330_v60 }
  0x1c   :  { %524 = vst [vmem:[#allocation3 + $0x194] sm:$0xf] %v3215_v26  ;;  %306 = vst [vmem:[#allocation3 + $0x154] sm:$0xf] %v3177_v27  ;;  %v3269_v10 = vpack.c.bf16 %v758_v4, %v758_v4  ;;  %v3217_v17 = vpack.c.bf16 %v76_v2, %v76_v2  ;;  %v759_v22 = vld [vmem:[#allocation2 + $0xc4] sm:$0xff] }
  0x1d   :  { %307 = vst [vmem:[#allocation3 + $0x170] sm:$0xf] %v3178_v28  ;;  %522 = vst [vmem:[#allocation3 + $0x15c] sm:$0xf] %v3180_v25  ;;  %v110_v61 = vld [vmem:[#allocation2 + $0x74] sm:$0xff]  ;;  %v3218_v21 = vpack.c.bf16 %v77_v3, %v77_v3  ;;  %v3270_v25 = vpack.c.bf16 %v759_v22, %v759_v22 }
  0x1e   :  { %520 = vst [vmem:[#allocation3 + $0x124] sm:$0xf] %v3178_v28  ;;  %519 = vst [vmem:[#allocation3 + $0x108] sm:$0xf] %v3177_v27  ;;  %v111_v62 = vld [vmem:[#allocation2 + $0x7c] sm:$0xff]  ;;  %v3161_v5 = vpack.c.bf16 %v110_v61, %v110_v61  ;;  %v325_v9 = vld [vmem:[#allocation2 + $0x84] sm:$0xff] }
  0x1f   :  { %311 = vst [vmem:[#allocation3 + $0x1e0] sm:$0xf] %v3215_v26  ;;  %737 = vst [vmem:[#allocation3 + $0x148] sm:$0xf] %v3215_v26  ;;  %v3162_v6 = vpack.c.bf16 %v111_v62, %v111_v62  ;;  %v326_v7 = vld [vmem:[#allocation2 + $0x8c] sm:$0xff]  ;;  %v327_v8 = vld [vmem:[#allocation2 + $0x94] sm:$0xff]  ;;  %v3196_v15 = vpack.c.bf16 %v325_v9, %v325_v9 }
  0x20   :  { %525 = vst [vmem:[#allocation3 + $0x1b0] sm:$0xf] %v3216_v32  ;;  %523 = vst [vmem:[#allocation3 + $0x178] sm:$0xf] %v3214_v33  ;;  %v3197_v11 = vpack.c.bf16 %v326_v7, %v326_v7  ;;  %v3198_v12 = vpack.c.bf16 %v327_v8, %v327_v8  ;;  %v328_v16 = vld [vmem:[#allocation2 + $0x9c] sm:$0xff] }
  0x21   :  { %83 = vst [vmem:[#allocation2 + $0x50] sm:$0xff] %v65_v34  ;;  %84 = vst [vmem:[#allocation2 + $0x58] sm:$0xff] %v66_v35  ;;  %v108_v13 = vld [vmem:[#allocation2 + $0x64] sm:$0xff]  ;;  %v109_v14 = vld [vmem:[#allocation2 + $0x6c] sm:$0xff]  ;;  %v3199_v20 = vpack.c.bf16 %v328_v16, %v328_v16 }
  0x22   :  { %310 = vst [vmem:[#allocation3 + $0x1c4] sm:$0xf] %v3214_v33  ;;  %738 = vst [vmem:[#allocation3 + $0x164] sm:$0xf] %v3216_v32  ;;  %v3159_v18 = vpack.c.bf16 %v108_v13, %v108_v13  ;;  %v3160_v19 = vpack.c.bf16 %v109_v14, %v109_v14 }
  0x23   :  { %736 = vst [vmem:[#allocation3 + $0x12c] sm:$0xf] %v3214_v33  ;;  %304 = vst [vmem:[#allocation3 + $0x11c] sm:$0xf] %v3175_v39 }
  0x24   :  { %305 = vst [vmem:[#allocation3 + $0x138] sm:$0xf] %v3176_v40  ;;  %81 = vst [vmem:[#allocation2 + $0x40] sm:$0xff] %v63_v41 }
  0x25   :  { %82 = vst [vmem:[#allocation2 + $0x48] sm:$0xff] %v64_v42  ;;  %518 = vst [vmem:[#allocation3 + $0xec] sm:$0xf] %v3176_v40  ;;  %v3280_v42 = vld [vmem:[#allocation3 + $0x18c] ss:$28 sps:$4 sm:$0xff]  }
  0x26   :  { %517 = vst [vmem:[#allocation3 + $0xd0] sm:$0xf] %v3175_v39  ;;  %302 = vst [vmem:[#allocation3 + $0xe4] sm:$0xf] %v3173_v46  ;;  %1776 = vmatprep.subr.bf16.mxu0 %v3280_v42 }
  0x27   :  { %303 = vst [vmem:[#allocation3 + $0x100] sm:$0xf] %v3174_v47  ;;  %79 = vst [vmem:[#allocation2 + $0x30] sm:$0xff] %v61_v48  ;;  %v3282_v43 = vld [vmem:[#allocation3 + $0x194] ss:$28 sps:$4 sm:$0xff]  }
  0x28   :  { %80 = vst [vmem:[#allocation2 + $0x38] sm:$0xff] %v62_v49  ;;  %516 = vst [vmem:[#allocation3 + $0xb4] sm:$0xf] %v3174_v47  ;;  %v106_v23 = vld [vmem:[#allocation2 + $0x54] sm:$0xff]  ;;  %v107_v24 = vld [vmem:[#allocation2 + $0x5c] sm:$0xff]  ;;  %1929 = vmatprep.subr.bf16.mxu1 %v3282_v43 }
  0x29   :  { %515 = vst [vmem:[#allocation3 + $0x98] sm:$0xf] %v3173_v46  ;;  %300 = vst [vmem:[#allocation3 + $0xac] sm:$0xf] %v3171_v51  ;;  %v3157_v26 = vpack.c.bf16 %v106_v23, %v106_v23  ;;  %v3158_v27 = vpack.c.bf16 %v107_v24, %v107_v24  ;;  %v3285_v46 = vld [vmem:[#allocation3 + $0x154] ss:$28 sps:$4 sm:$0xff]  }
  0x2a   :  { %301 = vst [vmem:[#allocation3 + $0xc8] sm:$0xf] %v3172_v52  ;;  %78 = vst [vmem:[#allocation2 + $0x28] sm:$0xff] %v60_v53  ;;  %v3287_v49 = vld [vmem:[#allocation3 + $0x15c] ss:$28 sps:$4 sm:$0xff]  }
  0x2b   :  { %514 = vst [vmem:[#allocation3 + $0x7c] sm:$0xf] %v3172_v52  ;;  %188 = vst [vmem:[#allocation3 + $0x38] sm:$0xf] %v3149_v54  ;;  %v3290_v52 = vld [vmem:[#allocation3 + $0x11c] ss:$28 sps:$4 sm:$0xff]  }
  0x2c   :  { %513 = vst [vmem:[#allocation3 + $0x60] sm:$0xf] %v3171_v51  ;;  %298 = vst [vmem:[#allocation3 + $0x74] sm:$0xf] %v3169_v56  ;;  %v104_v28 = vld [vmem:[#allocation2 + $0x44] sm:$0xff]  ;;  %v105_v29 = vld [vmem:[#allocation2 + $0x4c] sm:$0xff] }
  0x2d   :  { %299 = vst [vmem:[#allocation3 + $0x90] sm:$0xf] %v3170_v57  ;;  %189 = vst [vmem:[#allocation3 + $0x54] sm:$0xf] %v3150_v58  ;;  %v3155_v30 = vpack.c.bf16 %v104_v28, %v104_v28  ;;  %v3156_v31 = vpack.c.bf16 %v105_v29, %v105_v29  ;;  %v3292_v53 = vld [vmem:[#allocation3 + $0x124] ss:$28 sps:$4 sm:$0xff]  }
  0x2e   :  { %512 = vst [vmem:[#allocation3 + $0x44] sm:$0xf] %v3170_v57  ;;  %186 = vst [vmem:[#allocation3] sm:$0xf] %v3147_v59  ;;  %v3297_v59 = vld [vmem:[#allocation3 + $0xec] ss:$28 sps:$4 sm:$0xff]  }
  0x2f   :  { %402 = vst [vmem:[#allocation3 + $0x8] sm:$0xf] %v3150_v58  ;;  %511 = vst [vmem:[#allocation3 + $0x28] sm:$0xf] %v3169_v56  ;;  %v102_v32 = vld [vmem:[#allocation2 + $0x34] sm:$0xff]  ;;  %v103_v33 = vld [vmem:[#allocation2 + $0x3c] sm:$0xff] }
  0x30   :  { %297 = vst [vmem:[#allocation3 + $0x58] sm:$0xf] %v3168_v63  ;;  %187 = vst [vmem:[#allocation3 + $0x1c] sm:$0xf] %v3148_v0  ;;  %v3153_v34 = vpack.c.bf16 %v102_v32, %v102_v32  ;;  %v3154_v35 = vpack.c.bf16 %v103_v33, %v103_v33  ;;  %v3295_v58 = vld [vmem:[#allocation3 + $0xe4] ss:$28 sps:$4 sm:$0xff]  }
  0x31   :  { %510 = vst [vmem:[#allocation3 + $0xc] sm:$0xf] %v3168_v63  ;;  %94 = vst [vmem:[#allocation2 + $0xa8] sm:$0xff] %v76_v2  ;;  %v100_v36 = vld [vmem:[#allocation2 + $0x24] sm:$0xff]  ;;  %v101_v37 = vld [vmem:[#allocation2 + $0x2c] sm:$0xff] }
  0x32   :  { %95 = vst [vmem:[#allocation2 + $0xb0] sm:$0xff] %v77_v3  ;;  %200 = vst [vmem:[#allocation3 + $0x188] sm:$0xf] %v3161_v5  ;;  %v3151_v38 = vpack.c.bf16 %v100_v36, %v100_v36  ;;  %v3152_v39 = vpack.c.bf16 %v101_v37, %v101_v37  ;;  %v3300_v7 = vld [vmem:[#allocation3 + $0xac] ss:$28 sps:$4 sm:$0xff]   ;;  %v642_v37 = vld [vmem:[#allocation2 + $0x70] sm:$0xff] }
  0x33   :  { %201 = vst [vmem:[#allocation3 + $0x1a4] sm:$0xf] %v3162_v6  ;;  %414 = vst [vmem:[#allocation3 + $0x158] sm:$0xf] %v3162_v6  ;;  %v3302_v8 = vld [vmem:[#allocation3 + $0xb4] ss:$28 sps:$4 sm:$0xff]  }
  0x34   :  { %413 = vst [vmem:[#allocation3 + $0x13c] sm:$0xf] %v3161_v5  ;;  %848 = vst [vmem:[#allocation3 + $0x1a0] sm:$0xf] %v3269_v10  ;;  %v3305_v13 = vld [vmem:[#allocation3 + $0x74] ss:$28 sps:$4 sm:$0xff]  }
  0x35   :  { %635 = vst [vmem:[#allocation3 + $0x1ec] sm:$0xf] %v3269_v10  ;;  %416 = vst [vmem:[#allocation3 + $0x190] sm:$0xf] %v3197_v11  ;;  %v3307_v14 = vld [vmem:[#allocation3 + $0x7c] ss:$28 sps:$4 sm:$0xff]  }
  0x36   :  { %417 = vst [vmem:[#allocation3 + $0x1ac] sm:$0xf] %v3198_v12  ;;  %415 = vst [vmem:[#allocation3 + $0x174] sm:$0xf] %v3196_v15  ;;  %v3312_v32 = vld [vmem:[#allocation3 + $0x44] ss:$28 sps:$4 sm:$0xff]  }
  0x37   :  { %202 = vst [vmem:[#allocation3 + $0x1c0] sm:$0xf] %v3196_v15  ;;  %203 = vst [vmem:[#allocation3 + $0x1dc] sm:$0xf] %v3197_v11  ;;  %v534_v33 = vld [vmem:[#allocation2 + $0x64] sm:$0xff]  ;;  %v956_v43 = vld [vmem:[#allocation3 + $0x38] sm:$0xff] }
  0x38   :  { %526 = vst [vmem:[#allocation3 + $0x1cc] sm:$0xf] %v3217_v17  ;;  %630 = vst [vmem:[#allocation3 + $0x160] sm:$0xf] %v3198_v12  ;;  %v329_v60 = vld [vmem:[#allocation2 + $0xa4] sm:$0xff] }
  0x39   :  { %739 = vst [vmem:[#allocation3 + $0x180] sm:$0xf] %v3217_v17  ;;  %628 = vst [vmem:[#allocation3 + $0x128] sm:$0xf] %v3196_v15  ;;  %v1004_v40 = vld [vmem:[#allocation3 + $0x188] sm:$0xff]  ;;  %v3200_v63 = vpack.c.bf16 %v329_v60, %v329_v60  ;;  %v757_v3 = vld [vmem:[#allocation2 + $0xb4] sm:$0xff] }
  0x3a   :  { %629 = vst [vmem:[#allocation3 + $0x144] sm:$0xf] %v3197_v11  ;;  %198 = vst [vmem:[#allocation3 + $0x150] sm:$0xf] %v3159_v18  ;;  %v1008_v41 = vld [vmem:[#allocation3 + $0x1a4] sm:$0xff]  ;;  %v543_v61 = vld [vmem:[#allocation2 + $0xac] sm:$0xff]  ;;  %v3268_v4 = vpack.c.bf16 %v757_v3, %v757_v3 }
  0x3b   :  { %199 = vst [vmem:[#allocation3 + $0x16c] sm:$0xf] %v3160_v19  ;;  %412 = vst [vmem:[#allocation3 + $0x120] sm:$0xf] %v3160_v19  ;;  %v3133_v44 = vcombine.low %v1004_v40, %v1008_v41  ;;  %v3234_v0 = vpack.c.bf16 %v543_v61, %v543_v61  ;;  %v536_v17 = vld [vmem:[#allocation2 + $0x74] sm:$0xff]  ;;  %v3243_v40 = vpack.c.bf16 %v642_v37, %v642_v37  ;;  %v2393_v37 = vld [vmem:[%s4172_s2 + $0x28] sm:$0xff] }
  0x3c   :  { %411 = vst [vmem:[#allocation3 + $0x104] sm:$0xf] %v3159_v18  ;;  %418 = vst [vmem:[#allocation3 + $0x1c8] sm:$0xf] %v3199_v20  ;;  %v537_v18 = vld [vmem:[#allocation2 + $0x7c] sm:$0xff]  ;;  %v3227_v19 = vpack.c.bf16 %v536_v17, %v536_v17 }
  0x3d   :  { %527 = vst [vmem:[#allocation3 + $0x1e8] sm:$0xf] %v3218_v21  ;;  %740 = vst [vmem:[#allocation3 + $0x19c] sm:$0xf] %v3218_v21  ;;  %v3284_v45 = vld [vmem:[#allocation3 + $0x190] ss:$28 sps:$4 sm:$0xff]   ;;  %1777 = vmatpush1.bf16.xpose.msra.mxu0 %v3133_v44  ;;  %v3228_v22 = vpack.c.bf16 %v537_v18, %v537_v18 }
  0x3e   :  { %631 = vst [vmem:[#allocation3 + $0x17c] sm:$0xf] %v3199_v20  ;;  %844 = vst [vmem:[#allocation3 + $0x130] sm:$0xf] %v3199_v20  ;;  %1930 = vmatpush1.bf16.xpose.msra.mxu1 %v3284_v45  ;;  %1778 = vmatprep.subr.bf16.mxu0 %v3285_v46  ;;  %v3289_v51 = vld [vmem:[#allocation3 + $0x158] ss:$28 sps:$4 sm:$0xff]  }
  0x3f   :  { %849 = vst [vmem:[#allocation3 + $0x1bc] sm:$0xf] %v3270_v25  ;;  %196 = vst [vmem:[#allocation3 + $0x118] sm:$0xf] %v3157_v26  ;;  %1931 = vmatprep.subr.bf16.mxu1 %v3287_v49  ;;  %v644_v20 = vld [vmem:[#allocation2 + $0x80] sm:$0xff]  ;;  %v645_v21 = vld [vmem:[#allocation2 + $0x88] sm:$0xff] }
  0x40   :  { %197 = vst [vmem:[#allocation3 + $0x134] sm:$0xf] %v3158_v27  ;;  %410 = vst [vmem:[#allocation3 + $0xe8] sm:$0xf] %v3158_v27  ;;  %v3245_v23 = vpack.c.bf16 %v644_v20, %v644_v20  ;;  %v3246_v24 = vpack.c.bf16 %v645_v21, %v645_v21  ;;  %v752_v25 = vld [vmem:[#allocation2 + $0x8c] sm:$0xff]  ;;  %v960_v44 = vld [vmem:[#allocation3 + $0x54] sm:$0xff] }
  0x41   :  { %409 = vst [vmem:[#allocation3 + $0xcc] sm:$0xf] %v3157_v26  ;;  %194 = vst [vmem:[#allocation3 + $0xe0] sm:$0xf] %v3155_v30  ;;  %v996_v47 = vld [vmem:[#allocation3 + $0x150] sm:$0xff]  ;;  %v3263_v27 = vpack.c.bf16 %v752_v25, %v752_v25  ;;  %v533_v46 = vld [vmem:[#allocation2 + $0x5c] sm:$0xff] }
  0x42   :  { %195 = vst [vmem:[#allocation3 + $0xfc] sm:$0xf] %v3156_v31  ;;  %408 = vst [vmem:[#allocation3 + $0xb0] sm:$0xf] %v3156_v31  ;;  %v1000_v48 = vld [vmem:[#allocation3 + $0x16c] sm:$0xff]  ;;  %v753_v26 = vld [vmem:[#allocation2 + $0x94] sm:$0xff] }
  0x43   :  { %407 = vst [vmem:[#allocation3 + $0x94] sm:$0xf] %v3155_v30  ;;  %192 = vst [vmem:[#allocation3 + $0xa8] sm:$0xf] %v3153_v34  ;;  %v3126_v50 = vcombine.low %v996_v47, %v1000_v48  ;;  %v3294_v57 = vld [vmem:[#allocation3 + $0x120] ss:$28 sps:$4 sm:$0xff]   ;;  %v3264_v28 = vpack.c.bf16 %v753_v26, %v753_v26 }
  0x44   :  { %193 = vst [vmem:[#allocation3 + $0xc4] sm:$0xf] %v3154_v35  ;;  %406 = vst [vmem:[#allocation3 + $0x78] sm:$0xf] %v3154_v35  ;;  %v3310_v31 = vld [vmem:[#allocation3 + $0x3c] ss:$28 sps:$4 sm:$0xff]   ;;  %v3225_v35 = vpack.c.bf16 %v534_v33, %v534_v33 }
  0x45   :  { %405 = vst [vmem:[#allocation3 + $0x5c] sm:$0xf] %v3153_v34  ;;  %190 = vst [vmem:[#allocation3 + $0x70] sm:$0xf] %v3151_v38  ;;  %1779 = vmatpush1.bf16.xpose.msra.mxu0 %v3126_v50  ;;  %v535_v34 = vld [vmem:[#allocation2 + $0x6c] sm:$0xff]  ;;  %v532_v45 = vld [vmem:[#allocation2 + $0x54] sm:$0xff]  ;;  %v3224_v50 = vpack.c.bf16 %v533_v46, %v533_v46 }
  0x46   :  { %191 = vst [vmem:[#allocation3 + $0x8c] sm:$0xf] %v3152_v39  ;;  %404 = vst [vmem:[#allocation3 + $0x40] sm:$0xf] %v3152_v39  ;;  %1932 = vmatpush1.bf16.xpose.msra.mxu1 %v3289_v51  ;;  %v988_v54 = vld [vmem:[#allocation3 + $0x118] sm:$0xff]  ;;  %1780 = vmatprep.subr.bf16.mxu0 %v3290_v52  ;;  %v3226_v36 = vpack.c.bf16 %v535_v34, %v535_v34  ;;  %v751_v39 = vld [vmem:[#allocation2 + $0x84] sm:$0xff]  ;;  %v3223_v47 = vpack.c.bf16 %v532_v45, %v532_v45 }
  0x47   :  { %403 = vst [vmem:[#allocation3 + $0x24] sm:$0xf] %v3151_v38  ;;  %v992_v55 = vld [vmem:[#allocation3 + $0x134] sm:$0xff]  ;;  %1933 = vmatprep.subr.bf16.mxu1 %v3292_v53  ;;  %419 = vst [vmem:[#allocation3 + $0x1e4] sm:$0xf] %v3200_v63  ;;  %v3262_v42 = vpack.c.bf16 %v751_v39, %v751_v39  ;;  %v640_v48 = vld [vmem:[#allocation2 + $0x60] sm:$0xff]  ;;  %v3091_v53 = vcombine.low %v956_v43, %v960_v44 }
  0x48   :  { %v3119_v56 = vcombine.low %v988_v54, %v992_v55  ;;  %v980_v62 = vld [vmem:[#allocation3 + $0xe0] sm:$0xff]  ;;  %632 = vst [vmem:[#allocation3 + $0x198] sm:$0xf] %v3200_v63  ;;  %633 = vst [vmem:[#allocation3 + $0x1b4] sm:$0xf] %v3234_v0  ;;  %v643_v38 = vld [vmem:[#allocation2 + $0x78] sm:$0xff]  ;;  %v3241_v51 = vpack.c.bf16 %v640_v48, %v640_v48 }
  0x49   :  { %v984_v2 = vld [vmem:[#allocation3 + $0xfc] sm:$0xff]  ;;  %846 = vst [vmem:[#allocation3 + $0x168] sm:$0xf] %v3234_v0  ;;  %845 = vst [vmem:[#allocation3 + $0x14c] sm:$0xf] %v3200_v63  ;;  %v3244_v41 = vpack.c.bf16 %v643_v38, %v643_v38  ;;  %v641_v49 = vld [vmem:[#allocation2 + $0x68] sm:$0xff] }
  0x4a   :  { %v3112_v5 = vcombine.low %v980_v62, %v984_v2  ;;  %v3299_v6 = vld [vmem:[#allocation3 + $0xe8] ss:$28 sps:$4 sm:$0xff]   ;;  %847 = vst [vmem:[#allocation3 + $0x184] sm:$0xf] %v3268_v4  ;;  %634 = vst [vmem:[#allocation3 + $0x1d0] sm:$0xf] %v3268_v4  ;;  %v3242_v52 = vpack.c.bf16 %v641_v49, %v641_v49 }
  0x4b   :  { %v972_v9 = vld [vmem:[#allocation3 + $0xa8] sm:$0xff]  ;;  %626 = vst [vmem:[#allocation3 + $0xf0] sm:$0xf] %v3227_v19  ;;  %839 = vst [vmem:[#allocation3 + $0xa4] sm:$0xf] %v3227_v19  ;;  %v1012_v63 = vld [vmem:[#allocation3 + $0x1c0] sm:$0xff] }
  0x4c   :  { %v976_v10 = vld [vmem:[#allocation3 + $0xc4] sm:$0xff]  ;;  %v3304_v12 = vld [vmem:[#allocation3 + $0xb0] ss:$28 sps:$4 sm:$0xff]   ;;  %v3309_v30 = vld [vmem:[#allocation3 + $0x78] ss:$28 sps:$4 sm:$0xff]  }
  0x4d   :  { %1781 = vmatpush1.bf16.xpose.msra.mxu0 %v3119_v56  ;;  %v3105_v11 = vcombine.low %v972_v9, %v976_v10  ;;  %v964_v15 = vld [vmem:[#allocation3 + $0x70] sm:$0xff]  ;;  %627 = vst [vmem:[#allocation3 + $0x10c] sm:$0xf] %v3228_v22  ;;  %734 = vst [vmem:[#allocation3 + $0xf4] sm:$0xf] %v3245_v23  ;;  %v530_v0 = vld [vmem:[#allocation2 + $0x44] sm:$0xff] }
  0x4e   :  { %1934 = vmatpush1.bf16.xpose.msra.mxu1 %v3294_v57  ;;  %1782 = vmatprep.subr.bf16.mxu0 %v3295_v58  ;;  %v968_v16 = vld [vmem:[#allocation3 + $0x8c] sm:$0xff]  ;;  %735 = vst [vmem:[#allocation3 + $0x110] sm:$0xf] %v3246_v24  ;;  %840 = vst [vmem:[#allocation3 + $0xc0] sm:$0xf] %v3228_v22  ;;  %v948_v57 = vld [vmem:[#allocation3] sm:$0xff]  ;;  %v3221_v3 = vpack.c.bf16 %v530_v0, %v530_v0 }
  0x4f   :  { %1935 = vmatprep.subr.bf16.mxu1 %v3297_v59  ;;  %v3098_v29 = vcombine.low %v964_v15, %v968_v16  ;;  %842 = vst [vmem:[#allocation3 + $0xf8] sm:$0xf] %v3263_v27  ;;  %843 = vst [vmem:[#allocation3 + $0x114] sm:$0xf] %v3264_v28  ;;  %v3314_v54 = vld [vmem:[#allocation3 + $0x40] ss:$28 sps:$4 sm:$0xff]  }
  0x50   :  { %624 = vst [vmem:[#allocation3 + $0xb8] sm:$0xf] %v3225_v35  ;;  %625 = vst [vmem:[#allocation3 + $0xd4] sm:$0xf] %v3226_v36  ;;  %v3315_v55 = vld [vmem:[#allocation3 + $0x4] ss:$28 sps:$4 sm:$0xff]  }
  0x51   :  { %838 = vst [vmem:[#allocation3 + $0x88] sm:$0xf] %v3226_v36  ;;  %837 = vst [vmem:[#allocation3 + $0x6c] sm:$0xf] %v3225_v35  ;;  %v3317_v56 = vld [vmem:[#allocation3 + $0xc] ss:$28 sps:$4 sm:$0xff]  }
  0x52   :  { %732 = vst [vmem:[#allocation3 + $0xbc] sm:$0xf] %v3243_v40  ;;  %733 = vst [vmem:[#allocation3 + $0xd8] sm:$0xf] %v3244_v41  ;;  %v952_v58 = vld [vmem:[#allocation3 + $0x1c] sm:$0xff]  ;;  %v531_v2 = vld [vmem:[#allocation2 + $0x4c] sm:$0xff] }
  0x53   :  { %841 = vst [vmem:[#allocation3 + $0xdc] sm:$0xf] %v3262_v42  ;;  %622 = vst [vmem:[#allocation3 + $0x80] sm:$0xf] %v3223_v47  ;;  %v3084_v59 = vcombine.low %v948_v57, %v952_v58  ;;  %v3319_v60 = vld [vmem:[#allocation3 + $0x8] ss:$28 sps:$4 sm:$0xff]   ;;  %v3222_v4 = vpack.c.bf16 %v531_v2, %v531_v2 }
  0x54   :  { %835 = vst [vmem:[#allocation3 + $0x34] sm:$0xf] %v3223_v47  ;;  %623 = vst [vmem:[#allocation3 + $0x9c] sm:$0xf] %v3224_v50  ;;  %v3320_v61 = vld [vmem:[#allocation3 + $0x1c4] ss:$28 sps:$4 sm:$0xff]  }
  0x55   :  { %1783 = vmatpush1.bf16.xpose.msra.mxu0 %v3112_v5  ;;  %730 = vst [vmem:[#allocation3 + $0x84] sm:$0xf] %v3241_v51  ;;  %731 = vst [vmem:[#allocation3 + $0xa0] sm:$0xf] %v3242_v52  ;;  %v3322_v62 = vld [vmem:[#allocation3 + $0x1cc] ss:$28 sps:$4 sm:$0xff]  }
  0x56   :  { %1936 = vmatpush1.bf16.xpose.msra.mxu1 %v3299_v6  ;;  %1784 = vmatprep.subr.bf16.mxu0 %v3300_v7  ;;  %836 = vst [vmem:[#allocation3 + $0x50] sm:$0xf] %v3224_v50  ;;  %v638_v5 = vld [vmem:[#allocation2 + $0x50] sm:$0xff]  ;;  %v639_v6 = vld [vmem:[#allocation2 + $0x58] sm:$0xff]  ;;  %620 = vst [vmem:[#allocation3 + $0x48] sm:$0xf] %v3221_v3 }
  0x57   :  { %1937 = vmatprep.subr.bf16.mxu1 %v3302_v8  ;;  %v1016_v7 = vld [vmem:[#allocation3 + $0x1dc] sm:$0xff]  ;;  %v3239_v8 = vpack.c.bf16 %v638_v5, %v638_v5  ;;  %v3240_v9 = vpack.c.bf16 %v639_v6, %v639_v6  ;;  %621 = vst [vmem:[#allocation3 + $0x64] sm:$0xf] %v3222_v4  ;;  %834 = vst [vmem:[#allocation3 + $0x18] sm:$0xf] %v3222_v4  ;;  %v637_v18 = vld [vmem:[#allocation2 + $0x48] sm:$0xff] }
  0x58   :  { %v3324_v10 = vld [vmem:[#allocation3 + $0x1c8] ss:$28 sps:$4 sm:$0xff]   ;;  %v3238_v20 = vpack.c.bf16 %v637_v18, %v637_v18  ;;  %v2390_v21 = vld [vmem:[%s4172_s2 + $0x10] sm:$0xff]  ;;  %v3328_v24 = vld [vmem:[#allocation4 + $0x8] ss:$28 sps:$4 sm:$0xff]  }
  0x59   :  { %728 = vst [vmem:[#allocation3 + $0x4c] sm:$0xf] %v3239_v8  ;;  %729 = vst [vmem:[#allocation3 + $0x68] sm:$0xf] %v3240_v9  ;;  %v636_v17 = vld [vmem:[#allocation2 + $0x40] sm:$0xff]  ;;  %2424 = vperm.xlu1 %3279, %v2390_v21   ;;  %v2391_v27 = vld [vmem:[%s4172_s2 + $0x18] sm:$0xff] }
  0x5a   :  { %v3237_v19 = vpack.c.bf16 %v636_v17, %v636_v17  ;;  %727 = vst [vmem:[#allocation3 + $0x30] sm:$0xf] %v3238_v20  ;;  %v3325_v22 = vld [vmem:[#allocation4] ss:$28 sps:$4 sm:$0xff]   ;;  %v2388_v23 = vld [vmem:[%s4172_s2] sm:$0xff]  ;;  %v2397_v47 = vld [vmem:[%s4172_s2 + $0x48] sm:$0xff] }
  0x5b   :  { %v3331_v25 = vld [vmem:[#allocation3 + $0x198] ss:$28 sps:$4 sm:$0xff]   ;;  %2414 = vperm.xlu0 %3278, %v2388_v23   ;;  %v3339_v34 = vld [vmem:[#allocation4 + $0x38] ss:$28 sps:$4 sm:$0xff]   ;;  %v2392_v38 = vld [vmem:[%s4172_s2 + $0x20] sm:$0xff] }
  0x5c   :  { %726 = vst [vmem:[#allocation3 + $0x14] sm:$0xf] %v3237_v19  ;;  %v3335_v26 = vld [vmem:[#allocation4 + $0x3c] ss:$28 sps:$4 sm:$0xff]   ;;  %v3337_v28 = vld [vmem:[#allocation4 + $0x44] ss:$28 sps:$4 sm:$0xff]  }
  0x5d   :  { %1785 = vmatpush1.bf16.xpose.msra.mxu0 %v3105_v11  ;;  %v3140_v11 = vcombine.low %v1012_v63, %v1016_v7  ;;  %2429 = vperm.xlu1 %3279, %v2391_v27   ;;  %v761_v33 = vld [vmem:[#allocation2 + $0xd4] sm:$0xff]  ;;  %v3341_v40 = vld [vmem:[#allocation3 + $0x160] ss:$28 sps:$4 sm:$0xff]   ;;  %v3344_v42 = vld [vmem:[#allocation3 + $0x168] ss:$28 sps:$4 sm:$0xff]  }
  0x5e   :  { %1938 = vmatpush1.bf16.xpose.msra.mxu1 %v3304_v12  ;;  %1786 = vmatprep.subr.bf16.mxu0 %v3305_v13  ;;  %v3333_v12 = vld [vmem:[#allocation3 + $0x19c] ss:$28 sps:$4 sm:$0xff]   ;;  %v3272_v36 = vpack.c.bf16 %v761_v33, %v761_v33  ;;  %v3345_v43 = vld [vmem:[#allocation4 + $0x74] ss:$28 sps:$4 sm:$0xff]   ;;  %v3347_v44 = vld [vmem:[#allocation4 + $0x7c] ss:$28 sps:$4 sm:$0xff]  }
  0x5f   :  { %1939 = vmatprep.subr.bf16.mxu1 %v3307_v14  ;;  %v528_v13 = vld [vmem:[#allocation2 + $0x34] sm:$0xff]  ;;  %v529_v14 = vld [vmem:[#allocation2 + $0x3c] sm:$0xff]  ;;  %v3353_v45 = vld [vmem:[#allocation3 + $0x12c] ss:$28 sps:$4 sm:$0xff]  }
  0x60   :  { %v3219_v15 = vpack.c.bf16 %v528_v13, %v528_v13  ;;  %v3220_v16 = vpack.c.bf16 %v529_v14, %v529_v14  ;;  %v3340_v39 = vld [vmem:[#allocation4 + $0x40] ss:$28 sps:$4 sm:$0xff]   ;;  %851 = vst [vmem:[#allocation3 + $0x1f4] sm:$0xf] %v3272_v36  ;;  %v3349_v48 = vld [vmem:[#allocation4 + $0x70] ss:$28 sps:$4 sm:$0xff]  }
  0x61   :  { %2439 = vperm.xlu1 %3279, %v2393_v37   ;;  %v2395_v41 = vld [vmem:[%s4172_s2 + $0x38] sm:$0xff]  ;;  %v2394_v46 = vld [vmem:[%s4172_s2 + $0x30] sm:$0xff]  ;;  %v3351_v50 = vld [vmem:[#allocation3 + $0x128] ss:$28 sps:$4 sm:$0xff]  }
  0x62   :  { %618 = vst [vmem:[#allocation3 + $0x10] sm:$0xf] %v3219_v15  ;;  %619 = vst [vmem:[#allocation3 + $0x2c] sm:$0xf] %v3220_v16  ;;  %v3350_v49 = vld [vmem:[#allocation4 + $0x78] ss:$28 sps:$4 sm:$0xff]  }
  0x63   :  { %v3354_v51 = vld [vmem:[#allocation4 + $0xac] ss:$28 sps:$4 sm:$0xff]   ;;  %v2398_v57 = vld [vmem:[%s4172_s2 + $0x50] sm:$0xff]  ;;  %v3379_v2 = vld [vmem:[#allocation3 + $0xbc] ss:$28 sps:$4 sm:$0xff]  }
  0x64   :  { %v2396_v52 = vld [vmem:[%s4172_s2 + $0x40] sm:$0xff]  ;;  %v3367_v63 = vld [vmem:[#allocation3 + $0xf0] ss:$28 sps:$4 sm:$0xff]   ;;  %v3370_v0 = vld [vmem:[#allocation3 + $0xf8] ss:$28 sps:$4 sm:$0xff]  }
  0x65   :  { %1787 = vmatpush1.bf16.xpose.msra.mxu0 %v3098_v29  ;;  %v2389_v29 = vld [vmem:[%s4172_s2 + $0x8] sm:$0xff]  ;;  %2449 = vperm.xlu1 %3279, %v2395_v41   ;;  %v3358_v58 = vld [vmem:[#allocation4 + $0xa8] ss:$28 sps:$4 sm:$0xff]   ;;  %v3365_v5 = vld [vmem:[#allocation4 + $0xe0] ss:$28 sps:$4 sm:$0xff]  }
  0x66   :  { %1940 = vmatpush1.bf16.xpose.msra.mxu1 %v3309_v30  ;;  %1788 = vmatprep.subr.bf16.mxu0 %v3310_v31  ;;  %v3334_v30 = vld [vmem:[#allocation3 + $0x1a0] ss:$28 sps:$4 sm:$0xff]   ;;  %v3371_v7 = vld [vmem:[#allocation4 + $0x11c] ss:$28 sps:$4 sm:$0xff]   ;;  %v2405_v13 = vld [vmem:[%s4172_s2 + $0x88] sm:$0xff] }
  0x67   :  { %1941 = vmatprep.subr.bf16.mxu1 %v3312_v32  ;;  %v3343_v31 = vld [vmem:[#allocation3 + $0x164] ss:$28 sps:$4 sm:$0xff]   ;;  %2419 = vperm.xlu0 %3278, %v2389_v29   ;;  %v760_v32 = vld [vmem:[#allocation2 + $0xcc] sm:$0xff]  ;;  %v2403_v4 = vld [vmem:[%s4172_s2 + $0x78] sm:$0xff] }
  0x68   :  { %v3271_v35 = vpack.c.bf16 %v760_v32, %v760_v32  ;;  %v2400_v3 = vld [vmem:[%s4172_s2 + $0x60] sm:$0xff]  ;;  %v2402_v8 = vld [vmem:[%s4172_s2 + $0x70] sm:$0xff]  ;;  %v3373_v9 = vld [vmem:[#allocation4 + $0x124] ss:$28 sps:$4 sm:$0xff]  }
  0x69   :  { %2459 = vperm.xlu1 %3279, %v2397_v47   ;;  %v3366_v6 = vld [vmem:[#allocation4 + $0xe8] ss:$28 sps:$4 sm:$0xff]   ;;  %v3375_v15 = vld [vmem:[#allocation4 + $0x118] ss:$28 sps:$4 sm:$0xff]   ;;  %v3376_v16 = vld [vmem:[#allocation4 + $0x120] ss:$28 sps:$4 sm:$0xff]  }
  0x6a   :  { %850 = vst [vmem:[#allocation3 + $0x1d8] sm:$0xf] %v3271_v35  ;;  %v2404_v14 = vld [vmem:[%s4172_s2 + $0x80] sm:$0xff]  ;;  %v3381_v17 = vld [vmem:[#allocation4 + $0x154] ss:$28 sps:$4 sm:$0xff]   ;;  %v2407_v19 = vld [vmem:[%s4172_s2 + $0x98] sm:$0xff] }
  0x6b   :  { %2434 = vperm.xlu0 %3278, %v2392_v38   ;;  %v3383_v18 = vld [vmem:[#allocation4 + $0x15c] ss:$28 sps:$4 sm:$0xff]   ;;  %v3387_v20 = vld [vmem:[#allocation3 + $0x80] ss:$28 sps:$4 sm:$0xff]   ;;  %v3396_v21 = vld [vmem:[#allocation3 + $0x88] ss:$28 sps:$4 sm:$0xff]  }
  0x6c   :  { %v2406_v23 = vld [vmem:[%s4172_s2 + $0x90] sm:$0xff]  ;;  %v3390_v27 = vld [vmem:[#allocation4 + $0x18c] ss:$28 sps:$4 sm:$0xff]   ;;  %v3392_v29 = vld [vmem:[#allocation4 + $0x194] ss:$28 sps:$4 sm:$0xff]  }
  0x6d   :  { %1789 = vmatpush1.bf16.xpose.msra.mxu0 %v3091_v53  ;;  %v3356_v53 = vld [vmem:[#allocation4 + $0xb4] ss:$28 sps:$4 sm:$0xff]   ;;  %v3415_v32 = vld [vmem:[#allocation3 + $0x14] ss:$28 sps:$4 sm:$0xff]   ;;  %v2411_v33 = vld [vmem:[%s4172_s2 + $0xb8] sm:$0xff] }
  0x6e   :  { %1942 = vmatpush1.bf16.xpose.msra.mxu1 %v3314_v54  ;;  %1790 = vmatprep.subr.bf16.mxu0 %v3315_v55  ;;  %v3360_v54 = vld [vmem:[#allocation3 + $0x130] ss:$28 sps:$4 sm:$0xff]   ;;  %v3394_v35 = vld [vmem:[#allocation4 + $0x188] ss:$28 sps:$4 sm:$0xff]   ;;  %v3395_v36 = vld [vmem:[#allocation4 + $0x190] ss:$28 sps:$4 sm:$0xff]  }
  0x6f   :  { %1943 = vmatprep.subr.bf16.mxu1 %v3317_v56  ;;  %2444 = vperm.xlu0 %3278, %v2394_v46   ;;  %v3369_v55 = vld [vmem:[#allocation3 + $0xf4] ss:$28 sps:$4 sm:$0xff]   ;;  %v2399_v56 = vld [vmem:[%s4172_s2 + $0x58] sm:$0xff]  ;;  %v2581_v38 = vld [vmem:[%s4173_s3 + $0x8] sm:$0xff] }
  0x70   :  { %2469 = vperm.xlu1 %3279, %v2399_v56   ;;  %v3397_v37 = vld [vmem:[#allocation4 + $0x1c4] ss:$28 sps:$4 sm:$0xff]   ;;  %v3407_v47 = vld [vmem:[#allocation4 + $0x1fc] ss:$28 sps:$4 sm:$0xff]  }
  0x71   :  { %v3416_v41 = vld [vmem:[#allocation3 + $0x18] ss:$28 sps:$4 sm:$0xff]   ;;  %v3402_v46 = vld [vmem:[#allocation4 + $0x1c8] ss:$28 sps:$4 sm:$0xff]  }
  0x72   :  { %v3412_v56 = vld [vmem:[#allocation4 + $0x200] ss:$28 sps:$4 sm:$0xff]  }
  0x73   :  { %2454 = vperm.xlu0 %3278, %v2396_v52   ;;  %v2585_v52 = vld [vmem:[%s4173_s3 + $0x28] sm:$0xff] }
  0x75   :  { %1791 = vmatpush1.bf16.xpose.msra.mxu0 %v3084_v59  ;;  %v3359_v59 = vld [vmem:[#allocation4 + $0xb0] ss:$28 sps:$4 sm:$0xff]  }
  0x76   :  { %1944 = vmatpush1.bf16.xpose.msra.mxu1 %v3319_v60  ;;  %1806 = vmatprep.subr.bf16.mxu0 %v3320_v61  ;;  %v3361_v60 = vld [vmem:[#allocation4 + $0xe4] ss:$28 sps:$4 sm:$0xff]   ;;  %v2401_v61 = vld [vmem:[%s4172_s2 + $0x68] sm:$0xff] }
  0x77   :  { %1959 = vmatprep.subr.bf16.mxu1 %v3322_v62  ;;  %2464 = vperm.xlu0 %3278, %v2398_v57   ;;  %v3363_v62 = vld [vmem:[#allocation4 + $0xec] ss:$28 sps:$4 sm:$0xff]   ;;  %v3417_v57 = vld [vmem:[#allocation4 + $0x234] ss:$28 sps:$4 sm:$0xff]  }
  0x78   :  { %2479 = vperm.xlu1 %3279, %v2401_v61   ;;  %v2588_v61 = vld [vmem:[%s4173_s3 + $0x40] sm:$0xff] }
  0x7b   :  { %2474 = vperm.xlu0 %3278, %v2400_v3   ;;  %v2590_v3 = vld [vmem:[%s4173_s3 + $0x50] sm:$0xff] }
  0x7c   :  { %2489 = vperm.xlu1 %3279, %v2403_v4   ;;  %v3428_v4 = vld [vmem:[#allocation4 + $0x274] ss:$28 sps:$4 sm:$0xff]  }
  0x7d   :  { %1807 = vmatpush2.bf16.xpose.msra.mxu0 %v3140_v11  ;;  %v3380_v11 = vld [vmem:[#allocation3 + $0xc0] ss:$28 sps:$4 sm:$0xff]  }
  0x7e   :  { %1960 = vmatpush2.bf16.xpose.msra.mxu1 %v3324_v10  ;;  %2082 = vmatprep.subr.bf16.mxu0 %v3333_v12  ;;  %v3377_v10 = vld [vmem:[#allocation3 + $0xb8] ss:$28 sps:$4 sm:$0xff]   ;;  %v3389_v12 = vld [vmem:[#allocation3 + $0x84] ss:$28 sps:$4 sm:$0xff]  }
  0x7f   :  { %2235 = vmatprep.subr.bf16.mxu1 %v3507_v1  ;;  %2484 = vperm.xlu0 %3278, %v2402_v8   ;;  %v2595_v8 = vld [vmem:[%s4173_s3 + $0x78] sm:$0xff] }
  0x80   :  { %2499 = vperm.xlu1 %3279, %v2405_v13   ;;  %v2596_v13 = vld [vmem:[%s4173_s3 + $0x80] sm:$0xff] }
  0x83   :  { %2494 = vperm.xlu0 %3278, %v2404_v14   ;;  %v3433_v14 = vld [vmem:[#allocation4 + $0x10] ss:$28 sps:$4 sm:$0xff]  }
  0x84   :  { %1809 = vmatmul.mubr.bf16.vlgmr.msra.gmra.mxu0 %v3325_v22  ;;  %v3405_v22 = vld [vmem:[#allocation3 + $0x4c] ss:$28 sps:$4 sm:$0xff]   ;;  %2509 = vperm.xlu1 %3279, %v2407_v19  }
  0x85   :  { %1962 = vmatmul.mubr.bf16.vlgmr.msra.gmra.mxu1 %v3328_v24  ;;  %2083 = vmatpush1.bf16.xpose.msra.mxu0 %v3331_v25  ;;  %v3385_v24 = vld [vmem:[#allocation4 + $0x150] ss:$28 sps:$4 sm:$0xff]  }
  0x86   :  { %2236 = vmatpush1.bf16.xpose.msra.mxu1 %v3334_v30  ;;  %1818 = vmatprep.mubr.bf16.mxu0 %v3335_v26  ;;  %v2409_v25 = vld [vmem:[%s4172_s2 + $0xa8] sm:$0xff] }
  0x87   :  { %1971 = vmatprep.mubr.bf16.mxu1 %v3337_v28  ;;  %2084 = vmatprep.subr.bf16.mxu0 %v3343_v31  ;;  %v3386_v26 = vld [vmem:[#allocation4 + $0x158] ss:$28 sps:$4 sm:$0xff]   ;;  %v2408_v28 = vld [vmem:[%s4172_s2 + $0xa0] sm:$0xff] }
  0x88   :  { %2237 = vmatprep.subr.bf16.mxu1 %v3507_v1  ;;  %2504 = vperm.xlu0 %3278, %v2406_v23   ;;  %v3403_v30 = vld [vmem:[#allocation3 + $0x48] ss:$28 sps:$4 sm:$0xff]   ;;  %v3406_v31 = vld [vmem:[#allocation3 + $0x50] ss:$28 sps:$4 sm:$0xff]  }
  0x89   :  { %2519 = vperm.xlu1 %3279, %v2409_v25   ;;  %v2601_v19 = vld [vmem:[%s4173_s3 + $0xa8] sm:$0xff]  ;;  %v2602_v25 = vld [vmem:[%s4173_s3 + $0xb0] sm:$0xff] }
  0x8a   :  { %v3440_v23 = vld [vmem:[#allocation4 + $0x50] ss:$28 sps:$4 sm:$0xff]  }
  0x8c   :  { %1819 = vmatmul.mubr.bf16.gmra.mxu0 %v3339_v34  ;;  %2514 = vperm.xlu0 %3278, %v2408_v28   ;;  %v2410_v34 = vld [vmem:[%s4172_s2 + $0xb0] sm:$0xff] }
  0x8d   :  { %1972 = vmatmul.mubr.bf16.gmra.mxu1 %v3340_v39  ;;  %2085 = vmatpush1.bf16.xpose.msra.mxu0 %v3341_v40  ;;  %v3399_v39 = vld [vmem:[#allocation4 + $0x1cc] ss:$28 sps:$4 sm:$0xff]   ;;  %v3413_v40 = vld [vmem:[#allocation3 + $0x10] ss:$28 sps:$4 sm:$0xff]  }
  0x8e   :  { %2238 = vmatpush1.bf16.xpose.msra.mxu1 %v3344_v42  ;;  %1828 = vmatprep.mubr.bf16.mxu0 %v3345_v43  ;;  %v3425_v42 = vld [vmem:[#allocation3 + $0x1d4] ss:$28 sps:$4 sm:$0xff]   ;;  %v2580_v43 = vld [vmem:[%s4173_s3] sm:$0xff] }
  0x8f   :  { %1981 = vmatprep.mubr.bf16.mxu1 %v3347_v44  ;;  %2086 = vmatprep.subr.bf16.mxu0 %v3353_v45  ;;  %v2583_v44 = vld [vmem:[%s4173_s3 + $0x18] sm:$0xff]  ;;  %v3445_v28 = vld [vmem:[#allocation4 + $0xbc] ss:$28 sps:$4 sm:$0xff]  }
  0x90   :  { %2239 = vmatprep.subr.bf16.mxu1 %v3507_v1  ;;  %2529 = vperm.xlu1 %3279, %v2411_v33   ;;  %v3401_v45 = vld [vmem:[#allocation4 + $0x1c0] ss:$28 sps:$4 sm:$0xff]   ;;  %v3452_v33 = vld [vmem:[#allocation4 + $0xf8] ss:$28 sps:$4 sm:$0xff]  }
  0x91   :  { %2524 = vperm.xlu0 %3278, %v2410_v34   ;;  %v3453_v34 = vld [vmem:[#allocation4 + $0x12c] ss:$28 sps:$4 sm:$0xff]  }
  0x94   :  { %1829 = vmatmul.mubr.bf16.gmra.mxu0 %v3349_v48  ;;  %2611 = vperm.xlu1 %3279, %v2581_v38   ;;  %v2582_v48 = vld [vmem:[%s4173_s3 + $0x10] sm:$0xff] }
  0x95   :  { %1982 = vmatmul.mubr.bf16.gmra.mxu1 %v3350_v49  ;;  %1838 = vmatprep.mubr.bf16.mxu0 %v3354_v51  ;;  %v3409_v49 = vld [vmem:[#allocation4 + $0x204] ss:$28 sps:$4 sm:$0xff]  }
  0x96   :  { %1991 = vmatprep.mubr.bf16.mxu1 %v3356_v53  ;;  %2087 = vmatpush1.bf16.xpose.msra.mxu0 %v3351_v50  ;;  %v3423_v50 = vld [vmem:[#allocation3 + $0x1d0] ss:$28 sps:$4 sm:$0xff]   ;;  %v3432_v51 = vld [vmem:[#allocation3 + $0x1d8] ss:$28 sps:$4 sm:$0xff]   ;;  %v2584_v53 = vld [vmem:[%s4173_s3 + $0x20] sm:$0xff] }
  0x97   :  { %2240 = vmatpush1.bf16.xpose.msra.mxu1 %v3360_v54  ;;  %2088 = vmatprep.subr.bf16.mxu0 %v3369_v55  ;;  %v3411_v54 = vld [vmem:[#allocation4 + $0x1f8] ss:$28 sps:$4 sm:$0xff]   ;;  %v2587_v55 = vld [vmem:[%s4173_s3 + $0x38] sm:$0xff] }
  0x98   :  { %2241 = vmatprep.subr.bf16.mxu1 %v3507_v1  ;;  %2606 = vperm.xlu0 %3278, %v2580_v43   ;;  %v3459_v38 = vld [vmem:[#allocation4 + $0x160] ss:$28 sps:$4 sm:$0xff]   ;;  %v3465_v43 = vld [vmem:[#allocation4 + $0x1d4] ss:$28 sps:$4 sm:$0xff]  }
  0x99   :  { %2621 = vperm.xlu1 %3279, %v2583_v44   ;;  %v3467_v44 = vld [vmem:[#allocation4 + $0x1d0] ss:$28 sps:$4 sm:$0xff]  }
  0x9c   :  { %1839 = vmatmul.mubr.bf16.gmra.mxu0 %v3358_v58  ;;  %2616 = vperm.xlu0 %3278, %v2582_v48   ;;  %v2586_v58 = vld [vmem:[%s4173_s3 + $0x30] sm:$0xff]  ;;  %v3472_v48 = vld [vmem:[#allocation4 + $0x210] ss:$28 sps:$4 sm:$0xff]  }
  0x9d   :  { %1992 = vmatmul.mubr.bf16.gmra.mxu1 %v3359_v59  ;;  %1848 = vmatprep.mubr.bf16.mxu0 %v3361_v60  ;;  %v3419_v59 = vld [vmem:[#allocation4 + $0x23c] ss:$28 sps:$4 sm:$0xff]   ;;  %v2589_v60 = vld [vmem:[%s4173_s3 + $0x48] sm:$0xff] }
  0x9e   :  { %2001 = vmatprep.mubr.bf16.mxu1 %v3363_v62  ;;  %2089 = vmatpush1.bf16.xpose.msra.mxu0 %v3367_v63  ;;  %v3421_v62 = vld [vmem:[#allocation4 + $0x230] ss:$28 sps:$4 sm:$0xff]   ;;  %v2591_v63 = vld [vmem:[%s4173_s3 + $0x58] sm:$0xff] }
  0x9f   :  { %2242 = vmatpush1.bf16.xpose.msra.mxu1 %v3370_v0  ;;  %2090 = vmatprep.subr.bf16.mxu0 %v3379_v2  ;;  %v3422_v0 = vld [vmem:[#allocation4 + $0x238] ss:$28 sps:$4 sm:$0xff]   ;;  %v3426_v2 = vld [vmem:[#allocation4 + $0x26c] ss:$28 sps:$4 sm:$0xff]  }
  0xa0   :  { %2243 = vmatprep.subr.bf16.mxu1 %v3507_v1  ;;  %2631 = vperm.xlu1 %3279, %v2585_v52   ;;  %v3477_v52 = vld [vmem:[#allocation4 + $0x27c] ss:$28 sps:$4 sm:$0xff]  }
  0xa1   :  { %2626 = vperm.xlu0 %3278, %v2584_v53   ;;  %v3479_v53 = vld [vmem:[#allocation4 + $0x278] ss:$28 sps:$4 sm:$0xff]  }
  0xa4   :  { %1849 = vmatmul.mubr.bf16.gmra.mxu0 %v3365_v5  ;;  %2641 = vperm.xlu1 %3279, %v2587_v55   ;;  %v2593_v5 = vld [vmem:[%s4173_s3 + $0x68] sm:$0xff] }
  0xa5   :  { %2002 = vmatmul.mubr.bf16.gmra.mxu1 %v3366_v6  ;;  %1858 = vmatprep.mubr.bf16.mxu0 %v3371_v7  ;;  %v2592_v6 = vld [vmem:[%s4173_s3 + $0x60] sm:$0xff] }
  0xa6   :  { %2011 = vmatprep.mubr.bf16.mxu1 %v3373_v9  ;;  %2091 = vmatpush1.bf16.xpose.msra.mxu0 %v3377_v10  ;;  %v3430_v7 = vld [vmem:[#allocation4 + $0x268] ss:$28 sps:$4 sm:$0xff]   ;;  %v3431_v9 = vld [vmem:[#allocation4 + $0x270] ss:$28 sps:$4 sm:$0xff]  }
  0xa7   :  { %2244 = vmatpush1.bf16.xpose.msra.mxu1 %v3380_v11  ;;  %2092 = vmatprep.subr.bf16.mxu0 %v3389_v12  ;;  %v3435_v10 = vld [vmem:[#allocation4 + $0x14] ss:$28 sps:$4 sm:$0xff]   ;;  %v2594_v11 = vld [vmem:[%s4173_s3 + $0x70] sm:$0xff] }
  0xa8   :  { %2245 = vmatprep.subr.bf16.mxu1 %v3507_v1  ;;  %2636 = vperm.xlu0 %3278, %v2586_v58   ;;  %v2597_v12 = vld [vmem:[%s4173_s3 + $0x88] sm:$0xff] }
  0xa9   :  { %2651 = vperm.xlu1 %3279, %v2589_v60  }
  0xac   :  { %1859 = vmatmul.mubr.bf16.gmra.mxu0 %v3375_v15  ;;  %2646 = vperm.xlu0 %3278, %v2588_v61   ;;  %v2599_v15 = vld [vmem:[%s4173_s3 + $0x98] sm:$0xff] }
  0xad   :  { %2012 = vmatmul.mubr.bf16.gmra.mxu1 %v3376_v16  ;;  %1868 = vmatprep.mubr.bf16.mxu0 %v3381_v17  ;;  %v3436_v16 = vld [vmem:[#allocation4 + $0x18] ss:$28 sps:$4 sm:$0xff]   ;;  %v3437_v17 = vld [vmem:[#allocation4 + $0x4c] ss:$28 sps:$4 sm:$0xff]  }
  0xae   :  { %2021 = vmatprep.mubr.bf16.mxu1 %v3383_v18  ;;  %2093 = vmatpush1.bf16.xpose.msra.mxu0 %v3387_v20  ;;  %v2598_v18 = vld [vmem:[%s4173_s3 + $0x90] sm:$0xff]  ;;  %v2600_v20 = vld [vmem:[%s4173_s3 + $0xa0] sm:$0xff] }
  0xaf   :  { %2246 = vmatpush1.bf16.xpose.msra.mxu1 %v3396_v21  ;;  %2094 = vmatprep.subr.bf16.mxu0 %v3405_v22  ;;  %v3439_v21 = vld [vmem:[#allocation4 + $0x48] ss:$28 sps:$4 sm:$0xff]  }
  0xb0   :  { %2247 = vmatprep.subr.bf16.mxu1 %v3507_v1  ;;  %2661 = vperm.xlu1 %3279, %v2591_v63   ;;  %v2603_v22 = vld [vmem:[%s4173_s3 + $0xb8] sm:$0xff] }
  0xb1   :  { %2656 = vperm.xlu0 %3278, %v2590_v3  }
  0xb4   :  { %1869 = vmatmul.mubr.bf16.gmra.mxu0 %v3385_v24  ;;  %2671 = vperm.xlu1 %3279, %v2593_v5   ;;  %v3441_v24 = vld [vmem:[#allocation4 + $0x84] ss:$28 sps:$4 sm:$0xff]  }
  0xb5   :  { %2022 = vmatmul.mubr.bf16.gmra.mxu1 %v3386_v26  ;;  %1878 = vmatprep.mubr.bf16.mxu0 %v3390_v27  ;;  %v3443_v26 = vld [vmem:[#allocation4 + $0x80] ss:$28 sps:$4 sm:$0xff]   ;;  %v3444_v27 = vld [vmem:[#allocation4 + $0x88] ss:$28 sps:$4 sm:$0xff]  }
  0xb6   :  { %2031 = vmatprep.mubr.bf16.mxu1 %v3392_v29  ;;  %2095 = vmatpush1.bf16.xpose.msra.mxu0 %v3403_v30  ;;  %v3447_v29 = vld [vmem:[#allocation4 + $0xb8] ss:$28 sps:$4 sm:$0xff]   ;;  %v3448_v30 = vld [vmem:[#allocation4 + $0xc0] ss:$28 sps:$4 sm:$0xff]  }
  0xb7   :  { %2248 = vmatpush1.bf16.xpose.msra.mxu1 %v3406_v31  ;;  %2096 = vmatprep.subr.bf16.mxu0 %v3415_v32  ;;  %v3449_v31 = vld [vmem:[#allocation4 + $0xf4] ss:$28 sps:$4 sm:$0xff]  }
  0xb8   :  { %2249 = vmatprep.subr.bf16.mxu1 %v3507_v1  ;;  %2666 = vperm.xlu0 %3278, %v2592_v6   ;;  %v3451_v32 = vld [vmem:[#allocation4 + $0xf0] ss:$28 sps:$4 sm:$0xff]  }
  0xb9   :  { %2681 = vperm.xlu1 %3279, %v2595_v8  }
  0xbc   :  { %1879 = vmatmul.mubr.bf16.gmra.mxu0 %v3394_v35  ;;  %2676 = vperm.xlu0 %3278, %v2594_v11   ;;  %v3455_v35 = vld [vmem:[#allocation4 + $0x128] ss:$28 sps:$4 sm:$0xff]  }
  0xbd   :  { %2032 = vmatmul.mubr.bf16.gmra.mxu1 %v3395_v36  ;;  %1888 = vmatprep.mubr.bf16.mxu0 %v3397_v37  ;;  %v3456_v36 = vld [vmem:[#allocation4 + $0x130] ss:$28 sps:$4 sm:$0xff]   ;;  %v3457_v37 = vld [vmem:[#allocation4 + $0x164] ss:$28 sps:$4 sm:$0xff]  }
  0xbe   :  { %2041 = vmatprep.mubr.bf16.mxu1 %v3399_v39  ;;  %2097 = vmatpush1.bf16.xpose.msra.mxu0 %v3413_v40  ;;  %v3460_v39 = vld [vmem:[#allocation4 + $0x168] ss:$28 sps:$4 sm:$0xff]   ;;  %v3461_v40 = vld [vmem:[#allocation4 + $0x19c] ss:$28 sps:$4 sm:$0xff]  }
  0xbf   :  { %2250 = vmatpush1.bf16.xpose.msra.mxu1 %v3416_v41  ;;  %2112 = vmatprep.subr.bf16.mxu0 %v3425_v42  ;;  %v3463_v41 = vld [vmem:[#allocation4 + $0x198] ss:$28 sps:$4 sm:$0xff]   ;;  %v3464_v42 = vld [vmem:[#allocation4 + $0x1a0] ss:$28 sps:$4 sm:$0xff]  }
  0xc0   :  { %2265 = vmatprep.subr.bf16.mxu1 %v3507_v1  ;;  %2691 = vperm.xlu1 %3279, %v2597_v12  }
  0xc1   :  { %2686 = vperm.xlu0 %3278, %v2596_v13  }
  0xc4   :  { %1889 = vmatmul.mubr.bf16.gmra.mxu0 %v3401_v45  ;;  %2701 = vperm.xlu1 %3279, %v2599_v15   ;;  %v3468_v45 = vld [vmem:[#allocation4 + $0x1d8] ss:$28 sps:$4 sm:$0xff]  }
  0xc5   :  { %2042 = vmatmul.mubr.bf16.gmra.mxu1 %v3402_v46  ;;  %1898 = vmatprep.mubr.bf16.mxu0 %v3407_v47  ;;  %v3469_v46 = vld [vmem:[#allocation4 + $0x20c] ss:$28 sps:$4 sm:$0xff]  }
  0xc6   :  { %2051 = vmatprep.mubr.bf16.mxu1 %v3409_v49  ;;  %2113 = vmatpush2.bf16.xpose.msra.mxu0 %v3423_v50  ;;  %v3471_v47 = vld [vmem:[#allocation4 + $0x208] ss:$28 sps:$4 sm:$0xff]   ;;  %v3475_v50 = vld [vmem:[#allocation4 + $0x240] ss:$28 sps:$4 sm:$0xff]  }
  0xc7   :  { %2266 = vmatpush2.bf16.xpose.msra.mxu1 %v3432_v51  ;;  %2696 = vperm.xlu0 %3278, %v2598_v18   ;;  %v3473_v49 = vld [vmem:[#allocation4 + $0x244] ss:$28 sps:$4 sm:$0xff]  }
  0xc8   :  { %2711 = vperm.xlu1 %3279, %v2601_v19   ;;  %v3476_v51 = vld [vmem:[#allocation4 + $0x248] ss:$28 sps:$4 sm:$0xff]  }
  0xcb   :  { %2706 = vperm.xlu0 %3278, %v2600_v20  }
  0xcc   :  { %1899 = vmatmul.mubr.bf16.gmra.mxu0 %v3411_v54  ;;  %2721 = vperm.xlu1 %3279, %v2603_v22   ;;  %v3480_v54 = vld [vmem:[#allocation4 + $0x280] ss:$28 sps:$4 sm:$0xff]  }
  0xcd   :  { %2052 = vmatmul.mubr.bf16.gmra.mxu1 %v3412_v56  ;;  %1908 = vmatprep.mubr.bf16.mxu0 %v3417_v57 }
  0xce   :  { %2061 = vmatprep.mubr.bf16.mxu1 %v3419_v59 }
  0xcf   :  { %2716 = vperm.xlu0 %3278, %v2602_v25  }
  0xd4   :  { %1909 = vmatmul.mubr.bf16.gmra.mxu0 %v3421_v62 }
  0xd5   :  { %2062 = vmatmul.mubr.bf16.gmra.mxu1 %v3422_v0  ;;  %1918 = vmatprep.mubr.bf16.mxu0 %v3426_v2 }
  0xd6   :  { %2071 = vmatprep.mubr.bf16.mxu1 %v3428_v4 }
  0xdc   :  { %1919 = vmatmul.mubr.bf16.gmra.mxu0 %v3430_v7 }
  0xdd   :  { %2072 = vmatmul.mubr.bf16.gmra.mxu1 %v3431_v9  ;;  %2114 = vmatprep.mubr.bf16.mxu0 %v3435_v10 }
  0xde   :  { %2267 = vmatprep.mubr.bf16.mxu1 %v3507_v1 }
  0xe4   :  { %2115 = vmatmul.mubr.bf16.vlgmr.msra.gmra.mxu0 %v3433_v14 }
  0xe5   :  { %2268 = vmatmul.mubr.bf16.vlgmr.msra.gmra.mxu1 %v3436_v16  ;;  %2124 = vmatprep.mubr.bf16.mxu0 %v3437_v17 }
  0xe6   :  { %2277 = vmatprep.mubr.bf16.mxu1 %v3507_v1 }
  0xec   :  { %2125 = vmatmul.mubr.bf16.gmra.mxu0 %v3439_v21 }
  0xed   :  { %2278 = vmatmul.mubr.bf16.gmra.mxu1 %v3440_v23  ;;  %2134 = vmatprep.mubr.bf16.mxu0 %v3441_v24 }
  0xee   :  { %2287 = vmatprep.mubr.bf16.mxu1 %v3507_v1 }
  0xf4   :  { %2135 = vmatmul.mubr.bf16.gmra.mxu0 %v3443_v26 }
  0xf5   :  { %2288 = vmatmul.mubr.bf16.gmra.mxu1 %v3444_v27  ;;  %2144 = vmatprep.mubr.bf16.mxu0 %v3445_v28 }
  0xf6   :  { %2297 = vmatprep.mubr.bf16.mxu1 %v3507_v1 }
  0xfc   :  { %2145 = vmatmul.mubr.bf16.gmra.mxu0 %v3447_v29 }
  0xfd   :  { %2298 = vmatmul.mubr.bf16.gmra.mxu1 %v3448_v30  ;;  %2154 = vmatprep.mubr.bf16.mxu0 %v3449_v31 }
  0xfe   :  { %2307 = vmatprep.mubr.bf16.mxu1 %v3507_v1 }
 0x104   :  { %2155 = vmatmul.mubr.bf16.gmra.mxu0 %v3451_v32 }
 0x105   :  { %2308 = vmatmul.mubr.bf16.gmra.mxu1 %v3452_v33  ;;  %2164 = vmatprep.mubr.bf16.mxu0 %v3453_v34 }
 0x106   :  { %2317 = vmatprep.mubr.bf16.mxu1 %v3507_v1 }
 0x10c   :  { %2165 = vmatmul.mubr.bf16.gmra.mxu0 %v3455_v35  ;;  %v3790_v35 = vpop.permute.xlu0 %2414 }
 0x10d   :  { %2318 = vmatmul.mubr.bf16.gmra.mxu1 %v3456_v36  ;;  %2174 = vmatprep.mubr.bf16.mxu0 %v3457_v37 }
 0x10e   :  { %2327 = vmatprep.mubr.bf16.mxu1 %v3507_v1 }
 0x114   :  { %2175 = vmatmul.mubr.bf16.gmra.mxu0 %v3459_v38 }
 0x115   :  { %2328 = vmatmul.mubr.bf16.gmra.mxu1 %v3460_v39  ;;  %2184 = vmatprep.mubr.bf16.mxu0 %v3461_v40 }
 0x116   :  { %2337 = vmatprep.mubr.bf16.mxu1 %v3507_v1 }
 0x11c   :  { %2185 = vmatmul.mubr.bf16.gmra.mxu0 %v3463_v41 }
 0x11d   :  { %2338 = vmatmul.mubr.bf16.gmra.mxu1 %v3464_v42  ;;  %2194 = vmatprep.mubr.bf16.mxu0 %v3465_v43  ;;  %v3796_v42 = vpop.permute.xlu1 %2424 }
 0x11e   :  { %2347 = vmatprep.mubr.bf16.mxu1 %v3507_v1 }
 0x124   :  { %2195 = vmatmul.mubr.bf16.gmra.mxu0 %v3467_v44 }
 0x125   :  { %2348 = vmatmul.mubr.bf16.gmra.mxu1 %v3468_v45  ;;  %2204 = vmatprep.mubr.bf16.mxu0 %v3469_v46  ;;  %v3800_v46 = vpop.permute.xlu0 %2419 }
 0x126   :  { %2357 = vmatprep.mubr.bf16.mxu1 %v3507_v1 }
 0x12c   :  { %2205 = vmatmul.mubr.bf16.gmra.mxu0 %v3471_v47 }
 0x12d   :  { %2358 = vmatmul.mubr.bf16.gmra.mxu1 %v3472_v48  ;;  %2214 = vmatprep.mubr.bf16.mxu0 %v3473_v49 }
 0x12e   :  { %2367 = vmatprep.mubr.bf16.mxu1 %v3507_v1 }
 0x134   :  { %2215 = vmatmul.mubr.bf16.gmra.mxu0 %v3475_v50 }
 0x135   :  { %2368 = vmatmul.mubr.bf16.gmra.mxu1 %v3476_v51  ;;  %2224 = vmatprep.mubr.bf16.mxu0 %v3477_v52 }
 0x136   :  { %2377 = vmatprep.mubr.bf16.mxu1 %v3507_v1 }
 0x13c   :  { %2225 = vmatmul.mubr.bf16.gmra.mxu0 %v3479_v53  ;;  %v3806_v53 = vpop.permute.xlu1 %2429 }
 0x13d   :  { %2378 = vmatmul.mubr.bf16.gmra.mxu1 %v3480_v54 }
 0x144   :  { %v1810_v55 = vpop.f32.mrf.mxu0 }
 0x145   :  { %v1963_v56 = vpop.f32.mrf.mxu1 }
 0x146   :  { %v3762_v57 = vadd.f32 %v1963_v56, %v1810_v55  ;;  %v1812_v58 = vpop.f32.mrf.mxu0 }
 0x147   :  { %v1965_v59 = vpop.f32.mrf.mxu1 }
 0x148   :  { %v3764_v60 = vadd.f32 %v1965_v59, %v1812_v58  ;;  %v1814_v61 = vpop.f32.mrf.mxu0  ;;  %v3810_v58 = vpop.permute.xlu0 %2434 }
 0x149   :  { %v1967_v62 = vpop.f32.mrf.mxu1 }
 0x14a   :  { %v3766_v63 = vadd.f32 %v1967_v62, %v1814_v61  ;;  %v1816_v0 = vpop.f32.mrf.mxu0 }
 0x14b   :  { %v1969_v2 = vpop.f32.mrf.mxu1 }
 0x14c   :  { %v3768_v3 = vadd.f32 %v1969_v2, %v1816_v0  ;;  %v1820_v1 = vpop.f32.mrf.mxu0 }
 0x14d   :  { %v1973_v4 = vpop.f32.mrf.mxu1 }
 0x14e   :  { %v3770_v5 = vadd.f32 %v1973_v4, %v1820_v1  ;;  %v1822_v6 = vpop.f32.mrf.mxu0  ;;  %v3816_v4 = vpop.permute.xlu1 %2439 }
 0x14f   :  { %v1975_v7 = vpop.f32.mrf.mxu1 }
 0x150   :  { %v3772_v8 = vadd.f32 %v1975_v7, %v1822_v6  ;;  %v1824_v9 = vpop.f32.mrf.mxu0 }
 0x151   :  { %v1977_v10 = vpop.f32.mrf.mxu1 }
 0x152   :  { %v3774_v11 = vadd.f32 %v1977_v10, %v1824_v9  ;;  %v1826_v12 = vpop.f32.mrf.mxu0  ;;  %v3820_v10 = vpop.permute.xlu0 %2444 }
 0x153   :  { %v1979_v13 = vpop.f32.mrf.mxu1 }
 0x154   :  { %v3776_v14 = vadd.f32 %v1979_v13, %v1826_v12  ;;  %v1830_v15 = vpop.f32.mrf.mxu0 }
 0x155   :  { %v1983_v16 = vpop.f32.mrf.mxu1 }
 0x156   :  { %v3778_v17 = vadd.f32 %v1983_v16, %v1830_v15  ;;  %v1832_v18 = vpop.f32.mrf.mxu0 }
 0x157   :  { %v1985_v19 = vpop.f32.mrf.mxu1 }
 0x158   :  { %v3780_v20 = vadd.f32 %v1985_v19, %v1832_v18  ;;  %v1834_v21 = vpop.f32.mrf.mxu0 }
 0x159   :  { %v1987_v22 = vpop.f32.mrf.mxu1 }
 0x15a   :  { %v3782_v23 = vadd.f32 %v1987_v22, %v1834_v21  ;;  %v1836_v24 = vpop.f32.mrf.mxu0  ;;  %v3826_v21 = vpop.permute.xlu1 %2449 }
 0x15b   :  { %v1989_v25 = vpop.f32.mrf.mxu1 }
 0x15c   :  { %v3784_v26 = vadd.f32 %v1989_v25, %v1836_v24  ;;  %v1840_v27 = vpop.f32.mrf.mxu0 }
 0x15d   :  { %v1993_v28 = vpop.f32.mrf.mxu1 }
 0x15e   :  { %v3786_v29 = vadd.f32 %v1993_v28, %v1840_v27  ;;  %v1842_v30 = vpop.f32.mrf.mxu0  ;;  %v3830_v27 = vpop.permute.xlu0 %2454 }
 0x15f   :  { %v1995_v31 = vpop.f32.mrf.mxu1 }
 0x160   :  { %v3788_v32 = vadd.f32 %v1995_v31, %v1842_v30  ;;  %v1844_v33 = vpop.f32.mrf.mxu0 }
 0x161   :  { %v1997_v34 = vpop.f32.mrf.mxu1 }
 0x162   :  { %v3792_v36 = vadd.f32 %v1997_v34, %v1844_v33  ;;  %v1846_v37 = vpop.f32.mrf.mxu0 }
 0x163   :  { %v1999_v38 = vpop.f32.mrf.mxu1 }
 0x164   :  { %v3794_v39 = vadd.f32 %v1999_v38, %v1846_v37  ;;  %v1850_v40 = vpop.f32.mrf.mxu0  ;;  %v3836_v38 = vpop.permute.xlu1 %2459 }
 0x165   :  { %v2003_v41 = vpop.f32.mrf.mxu1 }
 0x166   :  { %v3798_v43 = vadd.f32 %v2003_v41, %v1850_v40  ;;  %v1852_v44 = vpop.f32.mrf.mxu0 }
 0x167   :  { %v2005_v45 = vpop.f32.mrf.mxu1 }
 0x168   :  { %v3802_v47 = vadd.f32 %v2005_v45, %v1852_v44  ;;  %v1854_v48 = vpop.f32.mrf.mxu0  ;;  %v3840_v45 = vpop.permute.xlu0 %2464 }
 0x169   :  { %v2007_v49 = vpop.f32.mrf.mxu1 }
 0x16a   :  { %v3804_v50 = vadd.f32 %v2007_v49, %v1854_v48  ;;  %v1856_v51 = vpop.f32.mrf.mxu0 }
 0x16b   :  { %v2009_v52 = vpop.f32.mrf.mxu1 }
 0x16c   :  { %v3808_v54 = vadd.f32 %v2009_v52, %v1856_v51  ;;  %v1860_v55 = vpop.f32.mrf.mxu0 }
 0x16d   :  { %v2013_v56 = vpop.f32.mrf.mxu1 }
 0x16e   :  { %v3812_v59 = vadd.f32 %v2013_v56, %v1860_v55  ;;  %v1862_v61 = vpop.f32.mrf.mxu0 }
 0x16f   :  { %v2015_v62 = vpop.f32.mrf.mxu1 }
 0x170   :  { %v3814_v0 = vadd.f32 %v2015_v62, %v1862_v61  ;;  %v1864_v2 = vpop.f32.mrf.mxu0  ;;  %v3846_v61 = vpop.permute.xlu1 %2469 }
 0x171   :  { %v2017_v1 = vpop.f32.mrf.mxu1 }
 0x172   :  { %v3818_v6 = vadd.f32 %v2017_v1, %v1864_v2  ;;  %v1866_v7 = vpop.f32.mrf.mxu0 }
 0x173   :  { %v2019_v9 = vpop.f32.mrf.mxu1 }
 0x174   :  { %v3822_v12 = vadd.f32 %v2019_v9, %v1866_v7  ;;  %v1870_v13 = vpop.f32.mrf.mxu0  ;;  %v3850_v7 = vpop.permute.xlu0 %2474 }
 0x175   :  { %v2023_v15 = vpop.f32.mrf.mxu1 }
 0x176   :  { %v3824_v16 = vadd.f32 %v2023_v15, %v1870_v13  ;;  %v1872_v18 = vpop.f32.mrf.mxu0 }
 0x177   :  { %v2025_v19 = vpop.f32.mrf.mxu1 }
 0x178   :  { %v3828_v22 = vadd.f32 %v2025_v19, %v1872_v18  ;;  %v1874_v24 = vpop.f32.mrf.mxu0 }
 0x179   :  { %v2027_v25 = vpop.f32.mrf.mxu1 }
 0x17a   :  { %v3832_v28 = vadd.f32 %v2027_v25, %v1874_v24  ;;  %v1876_v30 = vpop.f32.mrf.mxu0  ;;  %v3856_v25 = vpop.permute.xlu1 %2479 }
 0x17b   :  { %v2029_v31 = vpop.f32.mrf.mxu1 }
 0x17c   :  { %v3834_v33 = vadd.f32 %v2029_v31, %v1876_v30  ;;  %v1880_v34 = vpop.f32.mrf.mxu0 }
 0x17d   :  { %v2033_v37 = vpop.f32.mrf.mxu1 }
 0x17e   :  { %v3838_v40 = vadd.f32 %v2033_v37, %v1880_v34  ;;  %v1882_v41 = vpop.f32.mrf.mxu0  ;;  %v3860_v37 = vpop.permute.xlu0 %2484 }
 0x17f   :  { %v2035_v44 = vpop.f32.mrf.mxu1 }
 0x180   :  { %v3842_v48 = vadd.f32 %v2035_v44, %v1882_v41  ;;  %v1884_v49 = vpop.f32.mrf.mxu0 }
 0x181   :  { %v2037_v51 = vpop.f32.mrf.mxu1 }
 0x182   :  { %v3844_v52 = vadd.f32 %v2037_v51, %v1884_v49  ;;  %v1886_v55 = vpop.f32.mrf.mxu0 }
 0x183   :  { %v2039_v56 = vpop.f32.mrf.mxu1 }
 0x184   :  { %v3848_v62 = vadd.f32 %v2039_v56, %v1886_v55  ;;  %v1890_v2 = vpop.f32.mrf.mxu0 }
 0x185   :  { %v2043_v1 = vpop.f32.mrf.mxu1 }
 0x186   :  { %4184 = vst [vmem:[#allocation7_spill] sm:$0xff] %v3848_v62  ;;  %v3852_v9 = vadd.f32 %v2043_v1, %v1890_v2  ;;  %v1892_v13 = vpop.f32.mrf.mxu0  ;;  %v3866_v2 = vpop.permute.xlu1 %2489 }
 0x187   :  { %v2045_v15 = vpop.f32.mrf.mxu1  ;;  %4190 = vst [vmem:[#allocation13_spill] sm:$0xff] %v3866_v2 }
 0x188   :  { %4185 = vst [vmem:[#allocation8_spill] sm:$0xff] %v3852_v9  ;;  %v3854_v18 = vadd.f32 %v2045_v15, %v1892_v13  ;;  %v1894_v19 = vpop.f32.mrf.mxu0 }
 0x189   :  { %v2047_v24 = vpop.f32.mrf.mxu1 }
 0x18a   :  { %4186 = vst [vmem:[#allocation9_spill] sm:$0xff] %v3854_v18  ;;  %v3858_v30 = vadd.f32 %v2047_v24, %v1894_v19  ;;  %v1896_v31 = vpop.f32.mrf.mxu0  ;;  %v3870_v19 = vpop.permute.xlu0 %2494 }
 0x18b   :  { %v2049_v34 = vpop.f32.mrf.mxu1  ;;  %4192 = vst [vmem:[#allocation15_spill] sm:$0xff] %v3870_v19 }
 0x18c   :  { %4187 = vst [vmem:[#allocation10_spill] sm:$0xff] %v3858_v30  ;;  %v3862_v41 = vadd.f32 %v2049_v34, %v1896_v31  ;;  %v1900_v44 = vpop.f32.mrf.mxu0 }
 0x18d   :  { %v2053_v49 = vpop.f32.mrf.mxu1 }
 0x18e   :  { %4188 = vst [vmem:[#allocation11_spill] sm:$0xff] %v3862_v41  ;;  %v3864_v51 = vadd.f32 %v2053_v49, %v1900_v44  ;;  %v1902_v55 = vpop.f32.mrf.mxu0  ;;  %v3876_v44 = vpop.permute.xlu1 %2499 }
 0x18f   :  { %v2055_v56 = vpop.f32.mrf.mxu1  ;;  %4195 = vst [vmem:[#allocation18_spill] sm:$0xff] %v3876_v44 }
 0x190   :  { %4189 = vst [vmem:[#allocation12_spill] sm:$0xff] %v3864_v51  ;;  %v3868_v1 = vadd.f32 %v2055_v56, %v1902_v55  ;;  %v1904_v13 = vpop.f32.mrf.mxu0  ;;  %v3880_v55 = vpop.permute.xlu0 %2504 }
 0x191   :  { %v2057_v15 = vpop.f32.mrf.mxu1  ;;  %4197 = vst [vmem:[#allocation20_spill] sm:$0xff] %v3880_v55 }
 0x192   :  { %4191 = vst [vmem:[#allocation14_spill] sm:$0xff] %v3868_v1  ;;  %v3872_v24 = vadd.f32 %v2057_v15, %v1904_v13  ;;  %v1906_v30 = vpop.f32.mrf.mxu0 }
 0x193   :  { %v2059_v18 = vpop.f32.mrf.mxu1 }
 0x194   :  { %4193 = vst [vmem:[#allocation16_spill] sm:$0xff] %v3872_v24  ;;  %v3874_v31 = vadd.f32 %v2059_v18, %v1906_v30  ;;  %v1910_v34 = vpop.f32.mrf.mxu0  ;;  %v3886_v18 = vpop.permute.xlu1 %2509 }
 0x195   :  { %v2063_v41 = vpop.f32.mrf.mxu1  ;;  %4200 = vst [vmem:[#allocation23_spill] sm:$0xff] %v3886_v18 }
 0x196   :  { %4194 = vst [vmem:[#allocation17_spill] sm:$0xff] %v3874_v31  ;;  %v3878_v49 = vadd.f32 %v2063_v41, %v1910_v34  ;;  %v1912_v51 = vpop.f32.mrf.mxu0  ;;  %v3890_v41 = vpop.permute.xlu0 %2514 }
 0x197   :  { %v2065_v9 = vpop.f32.mrf.mxu1  ;;  %4202 = vst [vmem:[#allocation25_spill] sm:$0xff] %v3890_v41 }
 0x198   :  { %4196 = vst [vmem:[#allocation19_spill] sm:$0xff] %v3878_v49  ;;  %v3882_v56 = vadd.f32 %v2065_v9, %v1912_v51  ;;  %v1914_v1 = vpop.f32.mrf.mxu0 }
 0x199   :  { %v2067_v19 = vpop.f32.mrf.mxu1 }
 0x19a   :  { %4198 = vst [vmem:[#allocation21_spill] sm:$0xff] %v3882_v56  ;;  %v3884_v13 = vadd.f32 %v2067_v19, %v1914_v1  ;;  %v1916_v15 = vpop.f32.mrf.mxu0  ;;  %v3896_v1 = vpop.permute.xlu1 %2519 }
 0x19b   :  { %v2069_v24 = vpop.f32.mrf.mxu1  ;;  %4205 = vst [vmem:[#allocation28_spill] sm:$0xff] %v3896_v1 }
 0x19c   :  { %4199 = vst [vmem:[#allocation22_spill] sm:$0xff] %v3884_v13  ;;  %v3888_v30 = vadd.f32 %v2069_v24, %v1916_v15  ;;  %v1920_v31 = vpop.f32.mrf.mxu0  ;;  %v3900_v24 = vpop.permute.xlu0 %2524 }
 0x19d   :  { %v2073_v44 = vpop.f32.mrf.mxu1  ;;  %4207 = vst [vmem:[#allocation30_spill] sm:$0xff] %v3900_v24 }
 0x19e   :  { %4201 = vst [vmem:[#allocation24_spill] sm:$0xff] %v3888_v30  ;;  %v3892_v34 = vadd.f32 %v2073_v44, %v1920_v31  ;;  %v1922_v49 = vpop.f32.mrf.mxu0 }
 0x19f   :  { %v2075_v55 = vpop.f32.mrf.mxu1 }
 0x1a0   :  { %4203 = vst [vmem:[#allocation26_spill] sm:$0xff] %v3892_v34  ;;  %v3894_v9 = vadd.f32 %v2075_v55, %v1922_v49  ;;  %v1924_v51 = vpop.f32.mrf.mxu0 }
 0x1a1   :  { %v2077_v56 = vpop.f32.mrf.mxu1 }
 0x1a2   :  { %4204 = vst [vmem:[#allocation27_spill] sm:$0xff] %v3894_v9  ;;  %v3898_v19 = vadd.f32 %v2077_v56, %v1924_v51  ;;  %v1926_v13 = vpop.f32.mrf.mxu0  ;;  %v3906_v9 = vpop.permute.xlu1 %2529 }
 0x1a3   :  { %v2079_v18 = vpop.f32.mrf.mxu1  ;;  %4209 = vst [vmem:[#allocation32_spill] sm:$0xff] %v3906_v9 }
 0x1a4   :  { %4206 = vst [vmem:[#allocation29_spill] sm:$0xff] %v3898_v19  ;;  %v3902_v15 = vadd.f32 %v2079_v18, %v1926_v13  ;;  %v2116_v30 = vpop.f32.mrf.mxu0  ;;  %v2607_v13 = vpop.permute.xlu0 %2606 }
 0x1a5   :  { %v2117_v31 = vadd.f32 %v2116_v30, %v3762_v57  ;;  %v2269_v44 = vpop.f32.mrf.mxu1 }
 0x1a6   :  { %4208 = vst [vmem:[#allocation31_spill] sm:$0xff] %v3902_v15  ;;  %v2118_v34 = vpop.f32.mrf.mxu0 }
 0x1a7   :  { %v2270_v41 = vadd.f32 %v2269_v44, %v2117_v31  ;;  %v2119_v49 = vadd.f32 %v2118_v34, %v3764_v60  ;;  %v2271_v55 = vpop.f32.mrf.mxu1 }
 0x1a8   :  { %v2120_v1 = vpop.f32.mrf.mxu0 }
 0x1a9   :  { %v2532_v56 = vmul.f32 %v3790_v35, %v2270_v41  ;;  %v2272_v51 = vadd.f32 %v2271_v55, %v2119_v49  ;;  %v2121_v19 = vadd.f32 %v2120_v1, %v3766_v63  ;;  %v2273_v24 = vpop.f32.mrf.mxu1  ;;  %v2612_v49 = vpop.permute.xlu1 %2611 }
 0x1aa   :  { %v2122_v18 = vpop.f32.mrf.mxu0 }
 0x1ab   :  { %v2724_v15 = vadd.f32 %v2607_v13, %v2532_v56  ;;  %v2533_v57 = vmul.f32 %v3790_v35, %v2272_v51  ;;  %v2274_v30 = vadd.f32 %v2273_v24, %v2121_v19  ;;  %v2123_v31 = vadd.f32 %v2122_v18, %v3768_v3  ;;  %v2275_v44 = vpop.f32.mrf.mxu1 }
 0x1ac   :  { %v2126_v60 = vpop.f32.mrf.mxu0 }
 0x1ad   :  { %v2772_v34 = vmax.f32 %v2724_v15, 0.0  ;;  %v2725_v2 = vadd.f32 %v2607_v13, %v2533_v57  ;;  %v2534_v9 = vmul.f32 %v3800_v46, %v2274_v30  ;;  %v2276_v62 = vadd.f32 %v2275_v44, %v2123_v31  ;;  %v2279_v41 = vpop.f32.mrf.mxu1 }
 0x1ae   :  { %v2127_v63 = vadd.f32 %v2126_v60, %v3770_v5  ;;  %v2128_v1 = vpop.f32.mrf.mxu0 }
 0x1af   :  { %2820 = vst [vmem:[%s4174_s4] sm:$0xff] %v2772_v34  ;;  %v2773_v35 = vmax.f32 %v2725_v2, 0.0  ;;  %v2726_v19 = vadd.f32 %v2612_v49, %v2534_v9  ;;  %v2535_v3 = vmul.f32 %v3800_v46, %v2276_v62  ;;  %v2129_v24 = vadd.f32 %v2128_v1, %v3772_v8  ;;  %v2281_v15 = vpop.f32.mrf.mxu1  ;;  %v2617_v46 = vpop.permute.xlu0 %2616 }
 0x1b0   :  { %v2280_v55 = vadd.f32 %v2279_v41, %v2127_v63  ;;  %v2130_v56 = vpop.f32.mrf.mxu0 }
 0x1b1   :  { %2822 = vst.msk [vmem:[%s4174_s4 + $0x8] sm:$0xff] %vm2821_vm0, %v2773_v35  ;;  %v2774_v5 = vmax.f32 %v2726_v19, 0.0  ;;  %v2727_v51 = vadd.f32 %v2612_v49, %v2535_v3  ;;  %v2282_v13 = vadd.f32 %v2281_v15, %v2129_v24  ;;  %v2131_v18 = vadd.f32 %v2130_v56, %v3774_v11  ;;  %v2283_v57 = vpop.f32.mrf.mxu1  ;;  %v2622_v35 = vpop.permute.xlu1 %2621 }
 0x1b2   :  { %v2536_v2 = vmul.f32 %v3796_v42, %v2280_v55  ;;  %v2132_v9 = vpop.f32.mrf.mxu0 }
 0x1b3   :  { %2823 = vst [vmem:[%s4174_s4 + $0x10] sm:$0xff] %v2774_v5  ;;  %v2775_v8 = vmax.f32 %v2727_v51, 0.0  ;;  %v2537_v62 = vmul.f32 %v3796_v42, %v2282_v13  ;;  %v2284_v30 = vadd.f32 %v2283_v57, %v2131_v18  ;;  %v2133_v31 = vadd.f32 %v2132_v9, %v3776_v14  ;;  %v2285_v44 = vpop.f32.mrf.mxu1  ;;  %v2627_v57 = vpop.permute.xlu0 %2626 }
 0x1b4   :  { %v2728_v60 = vadd.f32 %v2617_v46, %v2536_v2  ;;  %v2136_v34 = vpop.f32.mrf.mxu0 }
 0x1b5   :  { %2824 = vst.msk [vmem:[%s4174_s4 + $0x18] sm:$0xff] %vm2821_vm0, %v2775_v8  ;;  %v2729_v11 = vadd.f32 %v2617_v46, %v2537_v62  ;;  %v2538_v41 = vmul.f32 %v3806_v53, %v2284_v30  ;;  %v2286_v49 = vadd.f32 %v2285_v44, %v2133_v31  ;;  %v2137_v63 = vadd.f32 %v2136_v34, %v3778_v17  ;;  %v2289_v1 = vpop.f32.mrf.mxu1 }
 0x1b6   :  { %v2776_v42 = vmax.f32 %v2728_v60, 0.0  ;;  %v2138_v19 = vpop.f32.mrf.mxu0 }
 0x1b7   :  { %v2777_v3 = vmax.f32 %v2729_v11, 0.0  ;;  %v2730_v14 = vadd.f32 %v2622_v35, %v2538_v41  ;;  %v2539_v24 = vmul.f32 %v3806_v53, %v2286_v49  ;;  %v2290_v15 = vadd.f32 %v2289_v1, %v2137_v63  ;;  %v2291_v55 = vpop.f32.mrf.mxu1  ;;  %v2632_v49 = vpop.permute.xlu1 %2631 }
 0x1b8   :  { %2825 = vst [vmem:[%s4174_s4 + $0x20] sm:$0xff] %v2776_v42  ;;  %v2139_v56 = vadd.f32 %v2138_v19, %v3780_v20  ;;  %v2140_v5 = vpop.f32.mrf.mxu0 }
 0x1b9   :  { %2826 = vst.msk [vmem:[%s4174_s4 + $0x28] sm:$0xff] %vm2821_vm0, %v2777_v3  ;;  %v2778_v17 = vmax.f32 %v2730_v14, 0.0  ;;  %v2731_v51 = vadd.f32 %v2622_v35, %v2539_v24  ;;  %v2540_v13 = vmul.f32 %v3810_v58, %v2290_v15  ;;  %v2141_v53 = vadd.f32 %v2140_v5, %v3782_v23  ;;  %v2293_v18 = vpop.f32.mrf.mxu1  ;;  %v2637_v5 = vpop.permute.xlu0 %2636 }
 0x1ba   :  { %v2292_v2 = vadd.f32 %v2291_v55, %v2139_v56  ;;  %v2142_v9 = vpop.f32.mrf.mxu0 }
 0x1bb   :  { %2827 = vst [vmem:[%s4174_s4 + $0x30] sm:$0xff] %v2778_v17  ;;  %v2779_v20 = vmax.f32 %v2731_v51, 0.0  ;;  %v2732_v46 = vadd.f32 %v2627_v57, %v2540_v13  ;;  %v2294_v8 = vadd.f32 %v2293_v18, %v2141_v53  ;;  %v2143_v62 = vadd.f32 %v2142_v9, %v3784_v26  ;;  %v2295_v30 = vpop.f32.mrf.mxu1 }
 0x1bc   :  { %v2541_v31 = vmul.f32 %v3810_v58, %v2292_v2  ;;  %v2146_v44 = vpop.f32.mrf.mxu0 }
 0x1bd   :  { %2828 = vst.msk [vmem:[%s4174_s4 + $0x38] sm:$0xff] %vm2821_vm0, %v2779_v20  ;;  %v2780_v23 = vmax.f32 %v2732_v46, 0.0  ;;  %v2542_v60 = vmul.f32 %v3816_v4, %v2294_v8  ;;  %v2296_v34 = vadd.f32 %v2295_v30, %v2143_v62  ;;  %v2147_v11 = vadd.f32 %v2146_v44, %v3786_v29  ;;  %v2299_v41 = vpop.f32.mrf.mxu1 }
 0x1be   :  { %v2733_v63 = vadd.f32 %v2627_v57, %v2541_v31  ;;  %v2148_v1 = vpop.f32.mrf.mxu0 }
 0x1bf   :  { %2829 = vst [vmem:[%s4174_s4 + $0x40] sm:$0xff] %v2780_v23  ;;  %v2734_v26 = vadd.f32 %v2632_v49, %v2542_v60  ;;  %v2543_v58 = vmul.f32 %v3816_v4, %v2296_v34  ;;  %v2300_v35 = vadd.f32 %v2299_v41, %v2147_v11  ;;  %v2149_v42 = vadd.f32 %v2148_v1, %v3788_v32  ;;  %v2301_v19 = vpop.f32.mrf.mxu1 }
 0x1c0   :  { %v2781_v3 = vmax.f32 %v2733_v63, 0.0  ;;  %v2150_v14 = vpop.f32.mrf.mxu0 }
 0x1c1   :  { %v2782_v24 = vmax.f32 %v2734_v26, 0.0  ;;  %v2735_v15 = vadd.f32 %v2632_v49, %v2543_v58  ;;  %v2544_v29 = vmul.f32 %v3820_v10, %v2300_v35  ;;  %v2302_v55 = vadd.f32 %v2301_v19, %v2149_v42  ;;  %v2303_v56 = vpop.f32.mrf.mxu1  ;;  %v2647_v26 = vpop.permute.xlu0 %2646 }
 0x1c2   :  { %2830 = vst.msk [vmem:[%s4174_s4 + $0x48] sm:$0xff] %vm2821_vm0, %v2781_v3  ;;  %v2151_v4 = vadd.f32 %v2150_v14, %v3792_v36  ;;  %v2152_v17 = vpop.f32.mrf.mxu0 }
 0x1c3   :  { %2831 = vst [vmem:[%s4174_s4 + $0x50] sm:$0xff] %v2782_v24  ;;  %v2783_v32 = vmax.f32 %v2735_v15, 0.0  ;;  %v2736_v51 = vadd.f32 %v2637_v5, %v2544_v29  ;;  %v2545_v13 = vmul.f32 %v3820_v10, %v2302_v55  ;;  %v2153_v53 = vadd.f32 %v2152_v17, %v3794_v39  ;;  %v2305_v18 = vpop.f32.mrf.mxu1  ;;  %v2642_v10 = vpop.permute.xlu1 %2641 }
 0x1c4   :  { %v2304_v57 = vadd.f32 %v2303_v56, %v2151_v4  ;;  %v2156_v2 = vpop.f32.mrf.mxu0 }
 0x1c5   :  { %2832 = vst.msk [vmem:[%s4174_s4 + $0x58] sm:$0xff] %vm2821_vm0, %v2783_v32  ;;  %v2784_v36 = vmax.f32 %v2736_v51, 0.0  ;;  %v2737_v9 = vadd.f32 %v2637_v5, %v2545_v13  ;;  %v2306_v20 = vadd.f32 %v2305_v18, %v2153_v53  ;;  %v2157_v46 = vadd.f32 %v2156_v2, %v3798_v43  ;;  %v2309_v8 = vpop.f32.mrf.mxu1 }
 0x1c6   :  { %v2546_v62 = vmul.f32 %v3826_v21, %v2304_v57  ;;  %v2158_v30 = vpop.f32.mrf.mxu0 }
 0x1c7   :  { %2833 = vst [vmem:[%s4174_s4 + $0x60] sm:$0xff] %v2784_v36  ;;  %v2785_v39 = vmax.f32 %v2737_v9, 0.0  ;;  %v2547_v31 = vmul.f32 %v3826_v21, %v2306_v20  ;;  %v2310_v44 = vadd.f32 %v2309_v8, %v2157_v46  ;;  %v2159_v23 = vadd.f32 %v2158_v30, %v3802_v47  ;;  %v2311_v60 = vpop.f32.mrf.mxu1  ;;  %v2652_v56 = vpop.permute.xlu1 %2651 }
 0x1c8   :  { %v2738_v34 = vadd.f32 %v2642_v10, %v2546_v62  ;;  %v2160_v11 = vpop.f32.mrf.mxu0  ;;  %v2657_v20 = vpop.permute.xlu0 %2656 }
 0x1c9   :  { %2834 = vst.msk [vmem:[%s4174_s4 + $0x68] sm:$0xff] %vm2821_vm0, %v2785_v39  ;;  %v2739_v43 = vadd.f32 %v2642_v10, %v2547_v31  ;;  %v2548_v41 = vmul.f32 %v3830_v27, %v2310_v44  ;;  %v2312_v49 = vadd.f32 %v2311_v60, %v2159_v23  ;;  %v2161_v63 = vadd.f32 %v2160_v11, %v3804_v50  ;;  %v2313_v1 = vpop.f32.mrf.mxu1 }
 0x1ca   :  { %v2786_v21 = vmax.f32 %v2738_v34, 0.0  ;;  %v2162_v58 = vpop.f32.mrf.mxu0 }
 0x1cb   :  { %v2787_v35 = vmax.f32 %v2739_v43, 0.0  ;;  %v2740_v47 = vadd.f32 %v2647_v26, %v2548_v41  ;;  %v2549_v42 = vmul.f32 %v3830_v27, %v2312_v49  ;;  %v2314_v19 = vadd.f32 %v2313_v1, %v2161_v63  ;;  %v2315_v3 = vpop.f32.mrf.mxu1  ;;  %v2662_v11 = vpop.permute.xlu1 %2661 }
 0x1cc   :  { %2835 = vst [vmem:[%s4174_s4 + $0x70] sm:$0xff] %v2786_v21  ;;  %v2163_v14 = vadd.f32 %v2162_v58, %v3808_v54  ;;  %v2166_v24 = vpop.f32.mrf.mxu0 }
 0x1cd   :  { %2836 = vst.msk [vmem:[%s4174_s4 + $0x78] sm:$0xff] %vm2821_vm0, %v2787_v35  ;;  %v2788_v50 = vmax.f32 %v2740_v47, 0.0  ;;  %v2741_v15 = vadd.f32 %v2647_v26, %v2549_v42  ;;  %v2550_v29 = vmul.f32 %v3836_v38, %v2314_v19  ;;  %v2167_v27 = vadd.f32 %v2166_v24, %v3812_v59  ;;  %v2319_v55 = vpop.f32.mrf.mxu1 }
 0x1ce   :  { %v2316_v5 = vadd.f32 %v2315_v3, %v2163_v14  ;;  %v2168_v4 = vpop.f32.mrf.mxu0 }
 0x1cf   :  { %2837 = vst [vmem:[%s4174_s4 + $0x80] sm:$0xff] %v2788_v50  ;;  %v2789_v54 = vmax.f32 %v2741_v15, 0.0  ;;  %v2742_v17 = vadd.f32 %v2652_v56, %v2550_v29  ;;  %v2320_v32 = vadd.f32 %v2319_v55, %v2167_v27  ;;  %v2169_v51 = vadd.f32 %v2168_v4, %v3814_v0  ;;  %v2321_v13 = vpop.f32.mrf.mxu1 }
 0x1d0   :  { %v2551_v53 = vmul.f32 %v3836_v38, %v2316_v5  ;;  %v2170_v18 = vpop.f32.mrf.mxu0 }
 0x1d1   :  { %2838 = vst.msk [vmem:[%s4174_s4 + $0x88] sm:$0xff] %vm2821_vm0, %v2789_v54  ;;  %v2790_v59 = vmax.f32 %v2742_v17, 0.0  ;;  %v2552_v57 = vmul.f32 %v3840_v45, %v2320_v32  ;;  %v2322_v2 = vadd.f32 %v2321_v13, %v2169_v51  ;;  %v2171_v36 = vadd.f32 %v2170_v18, %v3818_v6  ;;  %v2323_v9 = vpop.f32.mrf.mxu1  ;;  %v2672_v54 = vpop.permute.xlu1 %2671 }
 0x1d2   :  { %v2743_v46 = vadd.f32 %v2652_v56, %v2551_v53  ;;  %v2172_v8 = vpop.f32.mrf.mxu0 }
 0x1d3   :  { %2839 = vst [vmem:[%s4174_s4 + $0x90] sm:$0xff] %v2790_v59  ;;  %v2744_v0 = vadd.f32 %v2657_v20, %v2552_v57  ;;  %v2553_v38 = vmul.f32 %v3840_v45, %v2322_v2  ;;  %v2324_v62 = vadd.f32 %v2323_v9, %v2171_v36  ;;  %v2173_v30 = vadd.f32 %v2172_v8, %v3822_v12  ;;  %v2325_v10 = vpop.f32.mrf.mxu1 }
 0x1d4   :  { %v2791_v39 = vmax.f32 %v2743_v46, 0.0  ;;  %v2176_v31 = vpop.f32.mrf.mxu0 }
 0x1d5   :  { %v2792_v44 = vmax.f32 %v2744_v0, 0.0  ;;  %v2745_v23 = vadd.f32 %v2657_v20, %v2553_v38  ;;  %v2554_v6 = vmul.f32 %v3846_v61, %v2324_v62  ;;  %v2326_v60 = vadd.f32 %v2325_v10, %v2173_v30  ;;  %v2329_v34 = vpop.f32.mrf.mxu1  ;;  %v4210_v38 = vld [vmem:[#allocation7_spill] sm:$0xff] }
 0x1d6   :  { %2840 = vst.msk [vmem:[%s4174_s4 + $0x98] sm:$0xff] %vm2821_vm0, %v2791_v39  ;;  %v2177_v45 = vadd.f32 %v2176_v31, %v3824_v16  ;;  %v2178_v43 = vpop.f32.mrf.mxu0  ;;  %v4211_v31 = vld [vmem:[#allocation13_spill] sm:$0xff] }
 0x1d7   :  { %2841 = vst [vmem:[%s4174_s4 + $0xa0] sm:$0xff] %v2792_v44  ;;  %v2793_v12 = vmax.f32 %v2745_v23, 0.0  ;;  %v2746_v41 = vadd.f32 %v2662_v11, %v2554_v6  ;;  %v2555_v49 = vmul.f32 %v3846_v61, %v2326_v60  ;;  %v2179_v63 = vadd.f32 %v2178_v43, %v3828_v22  ;;  %v2331_v1 = vpop.f32.mrf.mxu1  ;;  %v2667_v61 = vpop.permute.xlu0 %2666  ;;  %v4212_v6 = vld [vmem:[#allocation8_spill] sm:$0xff] }
 0x1d8   :  { %v2330_v26 = vadd.f32 %v2329_v34, %v2177_v45  ;;  %v2180_v21 = vpop.f32.mrf.mxu0 }
 0x1d9   :  { %2842 = vst.msk [vmem:[%s4174_s4 + $0xa8] sm:$0xff] %vm2821_vm0, %v2793_v12  ;;  %v2794_v16 = vmax.f32 %v2746_v41, 0.0  ;;  %v2747_v58 = vadd.f32 %v2662_v11, %v2555_v49  ;;  %v2332_v35 = vadd.f32 %v2331_v1, %v2179_v63  ;;  %v2181_v47 = vadd.f32 %v2180_v21, %v3832_v28  ;;  %v2333_v42 = vpop.f32.mrf.mxu1  ;;  %v2682_v11 = vpop.permute.xlu1 %2681  ;;  %v4213_v49 = vld [vmem:[#allocation9_spill] sm:$0xff] }
 0x1da   :  { %v2556_v19 = vmul.f32 %v3850_v7, %v2330_v26  ;;  %v2182_v3 = vpop.f32.mrf.mxu0 }
 0x1db   :  { %2843 = vst [vmem:[%s4174_s4 + $0xb0] sm:$0xff] %v2794_v16  ;;  %v2795_v22 = vmax.f32 %v2747_v58, 0.0  ;;  %v2557_v14 = vmul.f32 %v3850_v7, %v2332_v35  ;;  %v2334_v24 = vadd.f32 %v2333_v42, %v2181_v47  ;;  %v2183_v50 = vadd.f32 %v2182_v3, %v3834_v33  ;;  %v2335_v15 = vpop.f32.mrf.mxu1  ;;  %v2677_v9 = vpop.permute.xlu0 %2676  ;;  %v4214_v35 = vld [vmem:[#allocation15_spill] sm:$0xff] }
 0x1dc   :  { %v2748_v29 = vadd.f32 %v2667_v61, %v2556_v19  ;;  %v2186_v27 = vpop.f32.mrf.mxu0 }
 0x1dd   :  { %2844 = vst.msk [vmem:[%s4174_s4 + $0xb8] sm:$0xff] %vm2821_vm0, %v2795_v22  ;;  %v2749_v28 = vadd.f32 %v2667_v61, %v2557_v14  ;;  %v2558_v55 = vmul.f32 %v3856_v25, %v2334_v24  ;;  %v2336_v56 = vadd.f32 %v2335_v15, %v2183_v50  ;;  %v2187_v5 = vadd.f32 %v2186_v27, %v3838_v40  ;;  %v2339_v4 = vpop.f32.mrf.mxu1  ;;  %v4215_v61 = vld [vmem:[#allocation10_spill] sm:$0xff] }
 0x1de   :  { %v2796_v7 = vmax.f32 %v2748_v29, 0.0  ;;  %v2188_v17 = vpop.f32.mrf.mxu0  ;;  %v4216_v29 = vld [vmem:[#allocation11_spill] sm:$0xff] }
 0x1df   :  { %v2797_v32 = vmax.f32 %v2749_v28, 0.0  ;;  %v2750_v33 = vadd.f32 %v2672_v54, %v2558_v55  ;;  %v2559_v51 = vmul.f32 %v3856_v25, %v2336_v56  ;;  %v2340_v13 = vadd.f32 %v2339_v4, %v2187_v5  ;;  %v2341_v53 = vpop.f32.mrf.mxu1  ;;  %v2687_v3 = vpop.permute.xlu0 %2686 }
 0x1e0   :  { %2845 = vst [vmem:[%s4174_s4 + $0xc0] sm:$0xff] %v2796_v7  ;;  %v2189_v18 = vadd.f32 %v2188_v17, %v3842_v48  ;;  %v2190_v59 = vpop.f32.mrf.mxu0  ;;  %v4217_v7 = vld [vmem:[#allocation12_spill] sm:$0xff] }
 0x1e1   :  { %2846 = vst.msk [vmem:[%s4174_s4 + $0xc8] sm:$0xff] %vm2821_vm0, %v2797_v32  ;;  %v2798_v40 = vmax.f32 %v2750_v33, 0.0  ;;  %v2751_v57 = vadd.f32 %v2672_v54, %v2559_v51  ;;  %v2560_v2 = vmul.f32 %v3860_v37, %v2340_v13  ;;  %v2191_v25 = vadd.f32 %v2190_v59, %v3844_v52  ;;  %v2343_v36 = vpop.f32.mrf.mxu1  ;;  %v4218_v33 = vld [vmem:[#allocation18_spill] sm:$0xff] }
 0x1e2   :  { %v2342_v20 = vadd.f32 %v2341_v53, %v2189_v18  ;;  %v2192_v46 = vpop.f32.mrf.mxu0  ;;  %v2692_v53 = vpop.permute.xlu1 %2691 }
 0x1e3   :  { %2847 = vst [vmem:[%s4174_s4 + $0xd0] sm:$0xff] %v2798_v40  ;;  %v2799_v48 = vmax.f32 %v2751_v57, 0.0  ;;  %v2752_v8 = vadd.f32 %v2677_v9, %v2560_v2  ;;  %v2344_v0 = vadd.f32 %v2343_v36, %v2191_v25  ;;  %v2193_v62 = vadd.f32 %v2192_v46, %v4210_v38  ;;  %v2345_v30 = vpop.f32.mrf.mxu1  ;;  %v4219_v57 = vld [vmem:[#allocation14_spill] sm:$0xff]  ;;  %v4220_v46 = vld [vmem:[#allocation20_spill] sm:$0xff] }
 0x1e4   :  { %v2561_v10 = vmul.f32 %v3860_v37, %v2342_v20  ;;  %v2196_v39 = vpop.f32.mrf.mxu0 }
 0x1e5   :  { %2848 = vst.msk [vmem:[%s4174_s4 + $0xd8] sm:$0xff] %vm2821_vm0, %v2799_v48  ;;  %v2800_v52 = vmax.f32 %v2752_v8, 0.0  ;;  %v2562_v44 = vmul.f32 %v4211_v31, %v2344_v0  ;;  %v2346_v23 = vadd.f32 %v2345_v30, %v2193_v62  ;;  %v2197_v60 = vadd.f32 %v2196_v39, %v4212_v6  ;;  %v2349_v34 = vpop.f32.mrf.mxu1  ;;  %v4221_v0 = vld [vmem:[#allocation16_spill] sm:$0xff]  ;;  %v2697_v30 = vpop.permute.xlu0 %2696 }
 0x1e6   :  { %v2753_v45 = vadd.f32 %v2677_v9, %v2561_v10  ;;  %v2198_v43 = vpop.f32.mrf.mxu0 }
 0x1e7   :  { %2849 = vst [vmem:[%s4174_s4 + $0xe0] sm:$0xff] %v2800_v52  ;;  %v2754_v37 = vadd.f32 %v2682_v11, %v2562_v44  ;;  %v2563_v12 = vmul.f32 %v4211_v31, %v2346_v23  ;;  %v2350_v41 = vadd.f32 %v2349_v34, %v2197_v60  ;;  %v2199_v63 = vadd.f32 %v2198_v43, %v4213_v49  ;;  %v2351_v1 = vpop.f32.mrf.mxu1  ;;  %v4222_v60 = vld [vmem:[#allocation17_spill] sm:$0xff] }
 0x1e8   :  { %v2801_v26 = vmax.f32 %v2753_v45, 0.0  ;;  %v2200_v21 = vpop.f32.mrf.mxu0 }
 0x1e9   :  { %v2802_v16 = vmax.f32 %v2754_v37, 0.0  ;;  %v2755_v58 = vadd.f32 %v2682_v11, %v2563_v12  ;;  %v2564_v47 = vmul.f32 %v4214_v35, %v2350_v41  ;;  %v2352_v42 = vadd.f32 %v2351_v1, %v2199_v63  ;;  %v2353_v19 = vpop.f32.mrf.mxu1  ;;  %v4223_v37 = vld [vmem:[#allocation23_spill] sm:$0xff]  ;;  %v2702_v1 = vpop.permute.xlu1 %2701 }
 0x1ea   :  { %2850 = vst.msk [vmem:[%s4174_s4 + $0xe8] sm:$0xff] %vm2821_vm0, %v2801_v26  ;;  %v2201_v22 = vadd.f32 %v2200_v21, %v4215_v61  ;;  %v2202_v14 = vpop.f32.mrf.mxu0  ;;  %v4224_v41 = vld [vmem:[#allocation19_spill] sm:$0xff] }
 0x1eb   :  { %2851 = vst [vmem:[%s4174_s4 + $0xf0] sm:$0xff] %v2802_v16  ;;  %v2803_v24 = vmax.f32 %v2755_v58, 0.0  ;;  %v2756_v50 = vadd.f32 %v2687_v3, %v2564_v47  ;;  %v2565_v15 = vmul.f32 %v4214_v35, %v2352_v42  ;;  %v2203_v27 = vadd.f32 %v2202_v14, %v4216_v29  ;;  %v2355_v28 = vpop.f32.mrf.mxu1  ;;  %v4225_v47 = vld [vmem:[#allocation21_spill] sm:$0xff] }
 0x1ec   :  { %v2354_v55 = vadd.f32 %v2353_v19, %v2201_v22  ;;  %v2206_v56 = vpop.f32.mrf.mxu0  ;;  %v4226_v14 = vld [vmem:[#allocation25_spill] sm:$0xff] }
 0x1ed   :  { %2852 = vst.msk [vmem:[%s4174_s4 + $0xf8] sm:$0xff] %vm2821_vm0, %v2803_v24  ;;  %v2804_v5 = vmax.f32 %v2756_v50, 0.0  ;;  %v2757_v4 = vadd.f32 %v2687_v3, %v2565_v15  ;;  %v2356_v54 = vadd.f32 %v2355_v28, %v2203_v27  ;;  %v2207_v17 = vadd.f32 %v2206_v56, %v4217_v7  ;;  %v2359_v32 = vpop.f32.mrf.mxu1  ;;  %v4227_v15 = vld [vmem:[#allocation22_spill] sm:$0xff]  ;;  %v2707_v28 = vpop.permute.xlu0 %2706  ;;  %v4228_v7 = vld [vmem:[#allocation24_spill] sm:$0xff] }
 0x1ee   :  { %v2566_v51 = vmul.f32 %v4218_v33, %v2354_v55  ;;  %v2208_v13 = vpop.f32.mrf.mxu0 }
 0x1ef   :  { %2853 = vst [vmem:[%s4174_s4 + $0x100] sm:$0xff] %v2804_v5  ;;  %v2805_v18 = vmax.f32 %v2757_v4, 0.0  ;;  %v2567_v59 = vmul.f32 %v4218_v33, %v2356_v54  ;;  %v2360_v40 = vadd.f32 %v2359_v32, %v2207_v17  ;;  %v2209_v2 = vadd.f32 %v2208_v13, %v4219_v57  ;;  %v2361_v25 = vpop.f32.mrf.mxu1 }
 0x1f0   :  { %v2758_v36 = vadd.f32 %v2692_v53, %v2566_v51  ;;  %v2210_v9 = vpop.f32.mrf.mxu0 }
 0x1f1   :  { %2854 = vst.msk [vmem:[%s4174_s4 + $0x108] sm:$0xff] %vm2821_vm0, %v2805_v18  ;;  %v2759_v20 = vadd.f32 %v2692_v53, %v2567_v59  ;;  %v2568_v48 = vmul.f32 %v4220_v46, %v2360_v40  ;;  %v2362_v8 = vadd.f32 %v2361_v25, %v2209_v2  ;;  %v2211_v38 = vadd.f32 %v2210_v9, %v4221_v0  ;;  %v2363_v62 = vpop.f32.mrf.mxu1  ;;  %v4229_v18 = vld [vmem:[#allocation28_spill] sm:$0xff]  ;;  %v2712_v2 = vpop.permute.xlu1 %2711  ;;  %v4230_v25 = vld [vmem:[#allocation26_spill] sm:$0xff] }
 0x1f2   :  { %v2806_v10 = vmax.f32 %v2758_v36, 0.0  ;;  %v2212_v39 = vpop.f32.mrf.mxu0 }
 0x1f3   :  { %v2807_v52 = vmax.f32 %v2759_v20, 0.0  ;;  %v2760_v31 = vadd.f32 %v2697_v30, %v2568_v48  ;;  %v2569_v44 = vmul.f32 %v4220_v46, %v2362_v8  ;;  %v2364_v23 = vadd.f32 %v2363_v62, %v2211_v38  ;;  %v2365_v6 = vpop.f32.mrf.mxu1  ;;  %v4231_v8 = vld [vmem:[#allocation27_spill] sm:$0xff] }
 0x1f4   :  { %2855 = vst [vmem:[%s4174_s4 + $0x110] sm:$0xff] %v2806_v10  ;;  %v2213_v34 = vadd.f32 %v2212_v39, %v4222_v60  ;;  %v2216_v11 = vpop.f32.mrf.mxu0 }
 0x1f5   :  { %2856 = vst.msk [vmem:[%s4174_s4 + $0x118] sm:$0xff] %vm2821_vm0, %v2807_v52  ;;  %v2808_v45 = vmax.f32 %v2760_v31, 0.0  ;;  %v2761_v43 = vadd.f32 %v2697_v30, %v2569_v44  ;;  %v2570_v12 = vmul.f32 %v4223_v37, %v2364_v23  ;;  %v2217_v49 = vadd.f32 %v2216_v11, %v4224_v41  ;;  %v2369_v63 = vpop.f32.mrf.mxu1  ;;  %v4232_v31 = vld [vmem:[#allocation29_spill] sm:$0xff]  ;;  %v2717_v11 = vpop.permute.xlu0 %2716 }
 0x1f6   :  { %v2366_v26 = vadd.f32 %v2365_v6, %v2213_v34  ;;  %v2218_v21 = vpop.f32.mrf.mxu0  ;;  %v4233_v6 = vld [vmem:[#allocation30_spill] sm:$0xff] }
 0x1f7   :  { %2857 = vst [vmem:[%s4174_s4 + $0x120] sm:$0xff] %v2808_v45  ;;  %v2809_v16 = vmax.f32 %v2761_v43, 0.0  ;;  %v2762_v58 = vadd.f32 %v2702_v1, %v2570_v12  ;;  %v2370_v35 = vadd.f32 %v2369_v63, %v2217_v49  ;;  %v2219_v42 = vadd.f32 %v2218_v21, %v4225_v47  ;;  %v2371_v19 = vpop.f32.mrf.mxu1  ;;  %v4234_v12 = vld [vmem:[#allocation31_spill] sm:$0xff] }
 0x1f8   :  { %v2571_v3 = vmul.f32 %v4223_v37, %v2366_v26  ;;  %v2220_v61 = vpop.f32.mrf.mxu0  ;;  %v4235_v26 = vld [vmem:[#allocation32_spill] sm:$0xff] }
 0x1f9   :  { %2858 = vst.msk [vmem:[%s4174_s4 + $0x128] sm:$0xff] %vm2821_vm0, %v2809_v16  ;;  %v2810_v22 = vmax.f32 %v2762_v58, 0.0  ;;  %v2572_v24 = vmul.f32 %v4226_v14, %v2370_v35  ;;  %v2372_v50 = vadd.f32 %v2371_v19, %v2219_v42  ;;  %v2221_v29 = vadd.f32 %v2220_v61, %v4227_v15  ;;  %v2373_v27 = vpop.f32.mrf.mxu1  ;;  %v2722_v58 = vpop.permute.xlu1 %2721 }
 0x1fa   :  { %v2763_v55 = vadd.f32 %v2702_v1, %v2571_v3  ;;  %v2222_v56 = vpop.f32.mrf.mxu0 }
 0x1fb   :  { %2859 = vst [vmem:[%s4174_s4 + $0x130] sm:$0xff] %v2810_v22  ;;  %v2764_v5 = vadd.f32 %v2707_v28, %v2572_v24  ;;  %v2573_v4 = vmul.f32 %v4226_v14, %v2372_v50  ;;  %v2374_v54 = vadd.f32 %v2373_v27, %v2221_v29  ;;  %v2223_v17 = vadd.f32 %v2222_v56, %v4228_v7  ;;  %v2375_v32 = vpop.f32.mrf.mxu1 }
 0x1fc   :  { %v2811_v33 = vmax.f32 %v2763_v55, 0.0  ;;  %v2226_v51 = vpop.f32.mrf.mxu0 }
 0x1fd   :  { %v2812_v13 = vmax.f32 %v2764_v5, 0.0  ;;  %v2765_v53 = vadd.f32 %v2707_v28, %v2573_v4  ;;  %v2574_v59 = vmul.f32 %v4229_v18, %v2374_v54  ;;  %v2376_v40 = vadd.f32 %v2375_v32, %v2223_v17  ;;  %v2379_v57 = vpop.f32.mrf.mxu1 }
 0x1fe   :  { %2860 = vst.msk [vmem:[%s4174_s4 + $0x138] sm:$0xff] %vm2821_vm0, %v2811_v33  ;;  %v2227_v36 = vadd.f32 %v2226_v51, %v4230_v25  ;;  %v2228_v9 = vpop.f32.mrf.mxu0 }
 0x1ff   :  { %2861 = vst [vmem:[%s4174_s4 + $0x140] sm:$0xff] %v2812_v13  ;;  %v2813_v20 = vmax.f32 %v2765_v53, 0.0  ;;  %v2766_v46 = vadd.f32 %v2712_v2, %v2574_v59  ;;  %v2575_v48 = vmul.f32 %v4229_v18, %v2376_v40  ;;  %v2229_v0 = vadd.f32 %v2228_v9, %v4231_v8  ;;  %v2381_v38 = vpop.f32.mrf.mxu1 }
 0x200   :  { %v2380_v62 = vadd.f32 %v2379_v57, %v2227_v36  ;;  %v2230_v30 = vpop.f32.mrf.mxu0 }
 0x201   :  { %2862 = vst.msk [vmem:[%s4174_s4 + $0x148] sm:$0xff] %vm2821_vm0, %v2813_v20  ;;  %v2814_v10 = vmax.f32 %v2766_v46, 0.0  ;;  %v2767_v39 = vadd.f32 %v2712_v2, %v2575_v48  ;;  %v2382_v52 = vadd.f32 %v2381_v38, %v2229_v0  ;;  %v2231_v44 = vadd.f32 %v2230_v30, %v4232_v31  ;;  %v2383_v23 = vpop.f32.mrf.mxu1 }
 0x202   :  { %v2576_v60 = vmul.f32 %v4233_v6, %v2380_v62  ;;  %v2232_v34 = vpop.f32.mrf.mxu0 }
 0x203   :  { %2863 = vst [vmem:[%s4174_s4 + $0x150] sm:$0xff] %v2814_v10  ;;  %v2815_v45 = vmax.f32 %v2767_v39, 0.0  ;;  %v2577_v43 = vmul.f32 %v4233_v6, %v2382_v52  ;;  %v2384_v37 = vadd.f32 %v2383_v23, %v2231_v44  ;;  %v2233_v41 = vadd.f32 %v2232_v34, %v4234_v12  ;;  %v2385_v63 = vpop.f32.mrf.mxu1 }
 0x204   :  { %v2768_v49 = vadd.f32 %v2717_v11, %v2576_v60 }
 0x205   :  { %2864 = vst.msk [vmem:[%s4174_s4 + $0x158] sm:$0xff] %vm2821_vm0, %v2815_v45  ;;  %v2769_v1 = vadd.f32 %v2717_v11, %v2577_v43  ;;  %v2578_v21 = vmul.f32 %v4235_v26, %v2384_v37  ;;  %v2386_v16 = vadd.f32 %v2385_v63, %v2233_v41 }
 0x206   :  { %v2816_v35 = vmax.f32 %v2768_v49, 0.0 }
 0x207   :  { %v2817_v47 = vmax.f32 %v2769_v1, 0.0  ;;  %v2770_v42 = vadd.f32 %v2722_v58, %v2578_v21  ;;  %v2579_v19 = vmul.f32 %v4235_v26, %v2386_v16 }
 0x208   :  { %2865 = vst [vmem:[%s4174_s4 + $0x160] sm:$0xff] %v2816_v35 }
 0x209   :  { %2866 = vst.msk [vmem:[%s4174_s4 + $0x168] sm:$0xff] %vm2821_vm0, %v2817_v47  ;;  %v2818_v3 = vmax.f32 %v2770_v42, 0.0  ;;  %v2771_v61 = vadd.f32 %v2722_v58, %v2579_v19 }
 0x20b   :  { %2867 = vst [vmem:[%s4174_s4 + $0x170] sm:$0xff] %v2818_v3  ;;  %v2819_v22 = vmax.f32 %v2771_v61, 0.0 }
 0x20d   :  { %2868 = vst.msk [vmem:[%s4174_s4 + $0x178] sm:$0xff] %vm2821_vm0, %v2819_v22 }
 0x20e   :  { %2873 = vsyncpa [#allocation5], 1 }

</bundles_post_ra>
